<compile_context>
chip_gen: v6e
topology: v6e:2x2x1
jax: 0.10.0
libtpu: 0.0.40
codegen_flags: <defaults>
</compile_context>

<pallas_src>
import jax
import jax.numpy as jnp
from jax.experimental import pallas as pl
from jax.experimental.pallas import tpu as pltpu


# ----------------------------------------------------------------------------
# Fused two-stack, multi-layer LSTM kernel (single pallas_call, no grid)
# ----------------------------------------------------------------------------
def _make_fused_lstm_kernel(B, T, D, H, L):
    S = 2 * H      # fused state width  [stack1 | stack2]
    G = 8 * H      # fused gate width   [i1 i2 f1 f2 o1 o2 g1 g2]

    def kernel(*refs):
        # refs: x, wih0, wih_l1..wih_l{L-1}, whh_l0..whh_l{L-1}, b_l0..b_l{L-1}, out
        x_ref = refs[0]
        wih0_ref = refs[1]
        wih_rest = refs[2:2 + (L - 1)]
        whh_refs = refs[2 + (L - 1):2 + (L - 1) + L]
        b_refs = refs[2 + (L - 1) + L:2 + (L - 1) + 2 * L]
        o_ref = refs[2 + (L - 1) + 2 * L]

        # fused hidden / cell state per layer: (B, 2H) = [stack1 | stack2]
        h = [jnp.zeros((B, S), jnp.float32) for _ in range(L)]
        c = [jnp.zeros((B, S), jnp.float32) for _ in range(L)]

        for t in range(T):                       # statically unrolled (T small)
            inp = x_ref[:, t, :]                 # (B, D) static slice, no transpose
            for l in range(L):
                w_in_ref = wih0_ref if l == 0 else wih_rest[l - 1]
                gates = (
                    jnp.dot(inp, w_in_ref[...],
                            preferred_element_type=jnp.float32)
                    + jnp.dot(h[l], whh_refs[l][...],
                              preferred_element_type=jnp.float32)
                    + b_refs[l][...]
                )                                # (B, 8H)
                sig = jax.nn.sigmoid(gates[:, :6 * H])   # i | f | o contiguous
                g_g = jnp.tanh(gates[:, 6 * H:])         # g (cell candidate)
                i_g = sig[:, 0 * S:1 * S]
                f_g = sig[:, 1 * S:2 * S]
                o_g = sig[:, 2 * S:3 * S]
                c[l] = f_g * c[l] + i_g * g_g
                h[l] = o_g * jnp.tanh(c[l])
                inp = h[l]
            # lane-dense output slab: columns [t*2H, (t+1)*2H) of (B, T*2H)
            o_ref[:, t * S:(t + 1) * S] = h[L - 1].astype(o_ref.dtype)

    return kernel


def fused_lstm_forward(x_btd, fused_params, H):
    """x_btd: (B, T, D) batch-first input.  Returns (o1, o2), each (B, T, H)."""
    B, T, D = x_btd.shape
    wih0, wih_rest, whhs, bs = fused_params
    L = len(whhs)
    kernel = _make_fused_lstm_kernel(B, T, D, H, L)
    inputs = (x_btd.astype(jnp.float32), wih0, *wih_rest, *whhs, *bs)
    out = pl.pallas_call(
        kernel,
        out_shape=jax.ShapeDtypeStruct((B, T * 2 * H), jnp.float32),
        in_specs=[pl.BlockSpec(memory_space=pltpu.MemorySpace.VMEM)
                  for _ in inputs],
        out_specs=pl.BlockSpec(memory_space=pltpu.MemorySpace.VMEM),
    )(*inputs)
    out = out.reshape(B, T, 2 * H)
    return out[..., :H], out[..., H:]


# ----------------------------------------------------------------------------
# Parameter construction: PyTorch-style init, then offline fusion/reordering
# ----------------------------------------------------------------------------
def init_lstm_params(key, input_size, hidden_size, num_layers):
    """PyTorch-layout params: per layer (w_ih (4H,Din), w_hh (4H,H), b (4H,)),
    gate order [i, f, g, o], bias = b_ih + b_hh."""
    k = 1.0 / jnp.sqrt(jnp.asarray(hidden_size, jnp.float32))
    layers = []
    d_in = input_size
    for _ in range(num_layers):
        key, k1, k2, k3, k4 = jax.random.split(key, 5)
        w_ih = jax.random.uniform(k1, (4 * hidden_size, d_in), jnp.float32, -k, k)
        w_hh = jax.random.uniform(k2, (4 * hidden_size, hidden_size), jnp.float32, -k, k)
        b_ih = jax.random.uniform(k3, (4 * hidden_size,), jnp.float32, -k, k)
        b_hh = jax.random.uniform(k4, (4 * hidden_size,), jnp.float32, -k, k)
        layers.append((w_ih, w_hh, b_ih + b_hh))
        d_in = hidden_size
    return layers, key


def fuse_two_stacks(p1, p2, H):
    """Build fused weights with column layout [i1 i2 f1 f2 o1 o2 g1 g2]."""
    L = len(p1)

    def gate_cols(wT):  # wT: (rows, 4H) torch gate order i,f,g,o along cols
        return wT[:, 0:H], wT[:, H:2 * H], wT[:, 2 * H:3 * H], wT[:, 3 * H:4 * H]

    def shared_input(w1, w2):            # (4H, Din) x2 -> (Din, 8H)
        i1, f1, g1, o1 = gate_cols(w1.T)
        i2, f2, g2, o2 = gate_cols(w2.T)
        return jnp.concatenate([i1, i2, f1, f2, o1, o2, g1, g2], axis=-1)

    def block_diag(w1, w2):              # (4H, H) x2 -> (2H, 8H) block-diagonal
        i1, f1, g1, o1 = gate_cols(w1.T)
        i2, f2, g2, o2 = gate_cols(w2.T)
        z = jnp.zeros_like(i1)
        top = jnp.concatenate([i1, z, f1, z, o1, z, g1, z], axis=-1)
        bot = jnp.concatenate([z, i2, z, f2, z, o2, z, g2], axis=-1)
        return jnp.concatenate([top, bot], axis=0)

    def fuse_bias(b1, b2):               # (4H,) x2 -> (1, 8H)
        def sp(b):
            return b[0:H], b[H:2 * H], b[2 * H:3 * H], b[3 * H:4 * H]
        i1, f1, g1, o1 = sp(b1)
        i2, f2, g2, o2 = sp(b2)
        return jnp.concatenate([i1, i2, f1, f2, o1, o2, g1, g2])[None, :]

    wih0 = shared_input(p1[0][0], p2[0][0])
    wih_rest = [block_diag(p1[l][0], p2[l][0]) for l in range(1, L)]
    whhs = [block_diag(p1[l][1], p2[l][1]) for l in range(L)]
    bs = [fuse_bias(p1[l][2], p2[l][2]) for l in range(L)]
    return wih0, wih_rest, whhs, bs


# ----------------------------------------------------------------------------
# Glue: frequency table + "rotary" concat (matches the torch reference)
# ----------------------------------------------------------------------------
def precompute_freqs_flat(dim, end, theta=10000.0):
    """Equivalent of view_as_real(precompute_freqs_cis(dim, end)).flatten(-2)."""
    inv = 1.0 / theta ** (jnp.arange(0, dim, 2)[: dim // 2].astype(jnp.float32) / dim)
    t = jnp.arange(end, dtype=jnp.float32)
    angles = jnp.outer(t, inv)                                    # (end, dim//2)
    return jnp.stack([jnp.cos(angles), jnp.sin(angles)], axis=-1).reshape(end, dim)


def apply_rotary_emb(x, freqs_flat, start, max_seq):
    """x: (B, max_seq, F); gather freqs_flat[start_i : start_i+max_seq] per batch
    and concat along the feature axis -> (B, max_seq, dim + F)."""
    def gather(s):
        return jax.lax.dynamic_slice(
            freqs_flat, (s, 0), (max_seq, freqs_flat.shape[1]))
    f = jax.vmap(gather)(start)                                   # (B, max_seq, dim)
    return jnp.concatenate([f, x], axis=-1).astype(x.dtype)


# ----------------------------------------------------------------------------
# Predictor module (deterministic synthetic parameters)
# ----------------------------------------------------------------------------
class PredictorPallas:
    def __init__(self, I1, I2, H, LSTM_LAYER, TRANSFORMER_LAYER, HEAD, max_seq,
                 key=jax.random.PRNGKey(0)):
        del TRANSFORMER_LAYER, HEAD  # unused by the reference forward pass
        in_size = I1 * 2 + I2 * 2
        self.H = H
        self.raw1, key = init_lstm_params(key, in_size, H, LSTM_LAYER)
        self.raw2, key = init_lstm_params(key, in_size, H, LSTM_LAYER)
        self.fused = fuse_two_stacks(self.raw1, self.raw2, H)
        f1 = precompute_freqs_flat(I1, 365)
        f2 = precompute_freqs_flat(I2, 365)
        self.freqs1 = jnp.concatenate([f1, f1], axis=0)   # (730, I1)
        self.freqs2 = jnp.concatenate([f2, f2], axis=0)   # (730, I2)
        self.max_seq = max_seq
        # TODO(synk): on v7x the two stacks could additionally be split across
        # the 2 TensorCores (core_map); kept single-core here for portability.

    def __call__(self, x1, x2, day_info):
        start = jnp.asarray(day_info[0], dtype=jnp.int32)
        _x1 = apply_rotary_emb(x1, self.freqs1, start, self.max_seq)  # (B, T, 2*I1)
        _x2 = apply_rotary_emb(x2, self.freqs2, start, self.max_seq)  # (B, T, 2*I2)
        _x = jnp.concatenate([_x1, _x2], axis=-1)                     # (B, T, D)
        return fused_lstm_forward(_x, self.fused, self.H)             # (B,T,H) x2


# ----------------------------------------------------------------------------
# Pure-JAX reference (for numerical validation only)
# ----------------------------------------------------------------------------
def _lstm_ref(x, layers):
    B, T, _ = x.shape
    out = x
    for (w_ih, w_hh, b) in layers:
        H = w_hh.shape[1]
        h = jnp.zeros((B, H), jnp.float32)
        c = jnp.zeros((B, H), jnp.float32)
        ys = []
        for t in range(T):
            g = out[:, t, :] @ w_ih.T + h @ w_hh.T + b
            i = jax.nn.sigmoid(g[:, 0:H])
            f = jax.nn.sigmoid(g[:, H:2 * H])
            gg = jnp.tanh(g[:, 2 * H:3 * H])
            o = jax.nn.sigmoid(g[:, 3 * H:4 * H])
            c = f * c + i * gg
            h = o * jnp.tanh(c)
            ys.append(h)
        out = jnp.stack(ys, axis=1)
    return out


# ----------------------------------------------------------------------------
if __name__ == "__main__":
    B, I1, I2, H = 2, 4, 4, 32
    LSTM_LAYER, TRANSFORMER_LAYER, HEAD, MAX_SEQ = 2, 1, 2, 8

    model = PredictorPallas(I1, I2, H, LSTM_LAYER, TRANSFORMER_LAYER, HEAD,
                            MAX_SEQ, key=jax.random.PRNGKey(0))

    key = jax.random.PRNGKey(0)
    k1, k2 = jax.random.split(key)
    x1 = jax.random.normal(k1, (B, MAX_SEQ, I1), jnp.float32)
    x2 = jax.random.normal(k2, (B, MAX_SEQ, I2), jnp.float32)
    start_day = jnp.array([3, 100], dtype=jnp.int32)
    end_day = start_day + MAX_SEQ                 # unused, matches reference
    day_info = (start_day, end_day)

    fwd = jax.jit(model.__call__)
    o1, o2 = fwd(x1, x2, day_info)
    o1 = jax.block_until_ready(o1)
    o2 = jax.block_until_ready(o2)

    assert o1.shape == (B, MAX_SEQ, H) and o2.shape == (B, MAX_SEQ, H)
    assert jnp.all(jnp.isfinite(o1)) and jnp.all(jnp.isfinite(o2))

    # numerical check against an un-fused pure-JAX LSTM reference
    _x1 = apply_rotary_emb(x1, model.freqs1, start_day, MAX_SEQ)
    _x2 = apply_rotary_emb(x2, model.freqs2, start_day, MAX_SEQ)
    _x = jnp.concatenate([_x1, _x2], axis=-1)
    r1 = _lstm_ref(_x, model.raw1)
    r2 = _lstm_ref(_x, model.raw2)
    err = max(float(jnp.max(jnp.abs(o1 - r1))), float(jnp.max(jnp.abs(o2 - r2))))
    assert err < 5e-3, f"mismatch vs reference: {err}"

    print("KERNEL_OK")
</pallas_src>

<mosaic_0001>
module attributes {stable_mosaic.version = 11 : i64} {
  func.func @kernel(%arg0: memref<2x8x16xf32, #tpu.memory_space<vmem>>, %arg1: memref<16x256xf32, #tpu.memory_space<vmem>>, %arg2: memref<64x256xf32, #tpu.memory_space<vmem>>, %arg3: memref<64x256xf32, #tpu.memory_space<vmem>>, %arg4: memref<64x256xf32, #tpu.memory_space<vmem>>, %arg5: memref<1x256xf32, #tpu.memory_space<vmem>>, %arg6: memref<1x256xf32, #tpu.memory_space<vmem>>, %arg7: memref<2x512xf32, #tpu.memory_space<vmem>>) attributes {dimension_semantics = [], scalar_prefetch = 0 : i64, scratch_operands = 0 : i64, tpu.core_type = #tpu.core_type<tc>} {
    %cst = arith.constant 0.000000e+00 : f32
    %0 = vector.broadcast %cst : f32 to vector<2x64xf32>
    %cst_0 = arith.constant 0.000000e+00 : f32
    %1 = vector.broadcast %cst_0 : f32 to vector<2x64xf32>
    %cst_1 = arith.constant 0.000000e+00 : f32
    %2 = vector.broadcast %cst_1 : f32 to vector<2x64xf32>
    %cst_2 = arith.constant 0.000000e+00 : f32
    %3 = vector.broadcast %cst_2 : f32 to vector<2x64xf32>
    %c0 = arith.constant 0 : index
    %c0_3 = arith.constant 0 : index
    %c0_4 = arith.constant 0 : index
    %4 = vector.load %arg0[%c0, %c0_3, %c0_4] : memref<2x8x16xf32, #tpu.memory_space<vmem>>, vector<2x1x16xf32>
    %5 = vector.shape_cast %4 : vector<2x1x16xf32> to vector<2x16xf32>
    %c0_5 = arith.constant 0 : index
    %c0_6 = arith.constant 0 : index
    %6 = vector.load %arg1[%c0_5, %c0_6] : memref<16x256xf32, #tpu.memory_space<vmem>>, vector<16x256xf32>
    %cst_7 = arith.constant dense<0.000000e+00> : vector<2x256xf32>
    %7 = tpu.matmul %5, %6, %cst_7 {dimension_numbers = #tpu.dot_dimension_numbers<[1], [0], [0], [1], [0, 0, 1, 1], [], []>} : vector<2x16xf32>, vector<16x256xf32>, vector<2x256xf32> -> vector<2x256xf32>
    %c0_8 = arith.constant 0 : index
    %c0_9 = arith.constant 0 : index
    %8 = vector.load %arg3[%c0_8, %c0_9] : memref<64x256xf32, #tpu.memory_space<vmem>>, vector<64x256xf32>
    %cst_10 = arith.constant dense<0.000000e+00> : vector<2x256xf32>
    %9 = tpu.matmul %0, %8, %cst_10 {dimension_numbers = #tpu.dot_dimension_numbers<[1], [0], [0], [1], [0, 0, 1, 1], [], []>} : vector<2x64xf32>, vector<64x256xf32>, vector<2x256xf32> -> vector<2x256xf32>
    %10 = arith.addf %7, %9 : vector<2x256xf32>
    %c0_11 = arith.constant 0 : index
    %c0_12 = arith.constant 0 : index
    %11 = vector.load %arg5[%c0_11, %c0_12] : memref<1x256xf32, #tpu.memory_space<vmem>>, vector<1x256xf32>
    %12 = vector.broadcast %11 : vector<1x256xf32> to vector<2x256xf32>
    %13 = arith.addf %10, %12 : vector<2x256xf32>
    %14 = vector.extract_strided_slice %13 {offsets = [0, 0], sizes = [2, 192], strides = [1, 1]} : vector<2x256xf32> to vector<2x192xf32>
    %15 = arith.negf %14 : vector<2x192xf32>
    %16 = math.exp %15 : vector<2x192xf32>
    %cst_13 = arith.constant 1.000000e+00 : f32
    %17 = vector.broadcast %cst_13 : f32 to vector<2x192xf32>
    %18 = arith.addf %17, %16 : vector<2x192xf32>
    %19 = arith.divf %17, %18 : vector<2x192xf32>
    %20 = vector.extract_strided_slice %13 {offsets = [0, 192], sizes = [2, 64], strides = [1, 1]} : vector<2x256xf32> to vector<2x64xf32>
    %21 = math.tanh %20 : vector<2x64xf32>
    %22 = vector.extract_strided_slice %19 {offsets = [0, 0], sizes = [2, 64], strides = [1, 1]} : vector<2x192xf32> to vector<2x64xf32>
    %23 = vector.extract_strided_slice %19 {offsets = [0, 64], sizes = [2, 64], strides = [1, 1]} : vector<2x192xf32> to vector<2x64xf32>
    %24 = vector.extract_strided_slice %19 {offsets = [0, 128], sizes = [2, 64], strides = [1, 1]} : vector<2x192xf32> to vector<2x64xf32>
    %25 = arith.mulf %23, %2 : vector<2x64xf32>
    %26 = arith.mulf %22, %21 : vector<2x64xf32>
    %27 = arith.addf %25, %26 : vector<2x64xf32>
    %28 = math.tanh %27 : vector<2x64xf32>
    %29 = arith.mulf %24, %28 : vector<2x64xf32>
    %c0_14 = arith.constant 0 : index
    %c0_15 = arith.constant 0 : index
    %30 = vector.load %arg2[%c0_14, %c0_15] : memref<64x256xf32, #tpu.memory_space<vmem>>, vector<64x256xf32>
    %cst_16 = arith.constant dense<0.000000e+00> : vector<2x256xf32>
    %31 = tpu.matmul %29, %30, %cst_16 {dimension_numbers = #tpu.dot_dimension_numbers<[1], [0], [0], [1], [0, 0, 1, 1], [], []>} : vector<2x64xf32>, vector<64x256xf32>, vector<2x256xf32> -> vector<2x256xf32>
    %c0_17 = arith.constant 0 : index
    %c0_18 = arith.constant 0 : index
    %32 = vector.load %arg4[%c0_17, %c0_18] : memref<64x256xf32, #tpu.memory_space<vmem>>, vector<64x256xf32>
    %cst_19 = arith.constant dense<0.000000e+00> : vector<2x256xf32>
    %33 = tpu.matmul %1, %32, %cst_19 {dimension_numbers = #tpu.dot_dimension_numbers<[1], [0], [0], [1], [0, 0, 1, 1], [], []>} : vector<2x64xf32>, vector<64x256xf32>, vector<2x256xf32> -> vector<2x256xf32>
    %34 = arith.addf %31, %33 : vector<2x256xf32>
    %c0_20 = arith.constant 0 : index
    %c0_21 = arith.constant 0 : index
    %35 = vector.load %arg6[%c0_20, %c0_21] : memref<1x256xf32, #tpu.memory_space<vmem>>, vector<1x256xf32>
    %36 = vector.broadcast %35 : vector<1x256xf32> to vector<2x256xf32>
    %37 = arith.addf %34, %36 : vector<2x256xf32>
    %38 = vector.extract_strided_slice %37 {offsets = [0, 0], sizes = [2, 192], strides = [1, 1]} : vector<2x256xf32> to vector<2x192xf32>
    %39 = arith.negf %38 : vector<2x192xf32>
    %40 = math.exp %39 : vector<2x192xf32>
    %cst_22 = arith.constant 1.000000e+00 : f32
    %41 = vector.broadcast %cst_22 : f32 to vector<2x192xf32>
    %42 = arith.addf %41, %40 : vector<2x192xf32>
    %43 = arith.divf %41, %42 : vector<2x192xf32>
    %44 = vector.extract_strided_slice %37 {offsets = [0, 192], sizes = [2, 64], strides = [1, 1]} : vector<2x256xf32> to vector<2x64xf32>
    %45 = math.tanh %44 : vector<2x64xf32>
    %46 = vector.extract_strided_slice %43 {offsets = [0, 0], sizes = [2, 64], strides = [1, 1]} : vector<2x192xf32> to vector<2x64xf32>
    %47 = vector.extract_strided_slice %43 {offsets = [0, 64], sizes = [2, 64], strides = [1, 1]} : vector<2x192xf32> to vector<2x64xf32>
    %48 = vector.extract_strided_slice %43 {offsets = [0, 128], sizes = [2, 64], strides = [1, 1]} : vector<2x192xf32> to vector<2x64xf32>
    %49 = arith.mulf %47, %3 : vector<2x64xf32>
    %50 = arith.mulf %46, %45 : vector<2x64xf32>
    %51 = arith.addf %49, %50 : vector<2x64xf32>
    %52 = math.tanh %51 : vector<2x64xf32>
    %53 = arith.mulf %48, %52 : vector<2x64xf32>
    %c0_23 = arith.constant 0 : index
    %c0_24 = arith.constant 0 : index
    %54 = vector.load %arg7[%c0_23, %c0_24] : memref<2x512xf32, #tpu.memory_space<vmem>>, vector<2x64xf32>
    tpu.vector_store %arg7[%c0_23, %c0_24], %53 {strides = array<i32>} : memref<2x512xf32, #tpu.memory_space<vmem>>, vector<2x64xf32>,
    %c0_25 = arith.constant 0 : index
    %c1 = arith.constant 1 : index
    %c0_26 = arith.constant 0 : index
    %55 = vector.load %arg0[%c0_25, %c1, %c0_26] : memref<2x8x16xf32, #tpu.memory_space<vmem>>, vector<2x1x16xf32>
    %56 = vector.shape_cast %55 : vector<2x1x16xf32> to vector<2x16xf32>
    %c0_27 = arith.constant 0 : index
    %c0_28 = arith.constant 0 : index
    %57 = vector.load %arg1[%c0_27, %c0_28] : memref<16x256xf32, #tpu.memory_space<vmem>>, vector<16x256xf32>
    %cst_29 = arith.constant dense<0.000000e+00> : vector<2x256xf32>
    %58 = tpu.matmul %56, %57, %cst_29 {dimension_numbers = #tpu.dot_dimension_numbers<[1], [0], [0], [1], [0, 0, 1, 1], [], []>} : vector<2x16xf32>, vector<16x256xf32>, vector<2x256xf32> -> vector<2x256xf32>
    %c0_30 = arith.constant 0 : index
    %c0_31 = arith.constant 0 : index
    %59 = vector.load %arg3[%c0_30, %c0_31] : memref<64x256xf32, #tpu.memory_space<vmem>>, vector<64x256xf32>
    %cst_32 = arith.constant dense<0.000000e+00> : vector<2x256xf32>
    %60 = tpu.matmul %29, %59, %cst_32 {dimension_numbers = #tpu.dot_dimension_numbers<[1], [0], [0], [1], [0, 0, 1, 1], [], []>} : vector<2x64xf32>, vector<64x256xf32>, vector<2x256xf32> -> vector<2x256xf32>
    %61 = arith.addf %58, %60 : vector<2x256xf32>
    %c0_33 = arith.constant 0 : index
    %c0_34 = arith.constant 0 : index
    %62 = vector.load %arg5[%c0_33, %c0_34] : memref<1x256xf32, #tpu.memory_space<vmem>>, vector<1x256xf32>
    %63 = vector.broadcast %62 : vector<1x256xf32> to vector<2x256xf32>
    %64 = arith.addf %61, %63 : vector<2x256xf32>
    %65 = vector.extract_strided_slice %64 {offsets = [0, 0], sizes = [2, 192], strides = [1, 1]} : vector<2x256xf32> to vector<2x192xf32>
    %66 = arith.negf %65 : vector<2x192xf32>
    %67 = math.exp %66 : vector<2x192xf32>
    %cst_35 = arith.constant 1.000000e+00 : f32
    %68 = vector.broadcast %cst_35 : f32 to vector<2x192xf32>
    %69 = arith.addf %68, %67 : vector<2x192xf32>
    %70 = arith.divf %68, %69 : vector<2x192xf32>
    %71 = vector.extract_strided_slice %64 {offsets = [0, 192], sizes = [2, 64], strides = [1, 1]} : vector<2x256xf32> to vector<2x64xf32>
    %72 = math.tanh %71 : vector<2x64xf32>
    %73 = vector.extract_strided_slice %70 {offsets = [0, 0], sizes = [2, 64], strides = [1, 1]} : vector<2x192xf32> to vector<2x64xf32>
    %74 = vector.extract_strided_slice %70 {offsets = [0, 64], sizes = [2, 64], strides = [1, 1]} : vector<2x192xf32> to vector<2x64xf32>
    %75 = vector.extract_strided_slice %70 {offsets = [0, 128], sizes = [2, 64], strides = [1, 1]} : vector<2x192xf32> to vector<2x64xf32>
    %76 = arith.mulf %74, %27 : vector<2x64xf32>
    %77 = arith.mulf %73, %72 : vector<2x64xf32>
    %78 = arith.addf %76, %77 : vector<2x64xf32>
    %79 = math.tanh %78 : vector<2x64xf32>
    %80 = arith.mulf %75, %79 : vector<2x64xf32>
    %c0_36 = arith.constant 0 : index
    %c0_37 = arith.constant 0 : index
    %81 = vector.load %arg2[%c0_36, %c0_37] : memref<64x256xf32, #tpu.memory_space<vmem>>, vector<64x256xf32>
    %cst_38 = arith.constant dense<0.000000e+00> : vector<2x256xf32>
    %82 = tpu.matmul %80, %81, %cst_38 {dimension_numbers = #tpu.dot_dimension_numbers<[1], [0], [0], [1], [0, 0, 1, 1], [], []>} : vector<2x64xf32>, vector<64x256xf32>, vector<2x256xf32> -> vector<2x256xf32>
    %c0_39 = arith.constant 0 : index
    %c0_40 = arith.constant 0 : index
    %83 = vector.load %arg4[%c0_39, %c0_40] : memref<64x256xf32, #tpu.memory_space<vmem>>, vector<64x256xf32>
    %cst_41 = arith.constant dense<0.000000e+00> : vector<2x256xf32>
    %84 = tpu.matmul %53, %83, %cst_41 {dimension_numbers = #tpu.dot_dimension_numbers<[1], [0], [0], [1], [0, 0, 1, 1], [], []>} : vector<2x64xf32>, vector<64x256xf32>, vector<2x256xf32> -> vector<2x256xf32>
    %85 = arith.addf %82, %84 : vector<2x256xf32>
    %c0_42 = arith.constant 0 : index
    %c0_43 = arith.constant 0 : index
    %86 = vector.load %arg6[%c0_42, %c0_43] : memref<1x256xf32, #tpu.memory_space<vmem>>, vector<1x256xf32>
    %87 = vector.broadcast %86 : vector<1x256xf32> to vector<2x256xf32>
    %88 = arith.addf %85, %87 : vector<2x256xf32>
    %89 = vector.extract_strided_slice %88 {offsets = [0, 0], sizes = [2, 192], strides = [1, 1]} : vector<2x256xf32> to vector<2x192xf32>
    %90 = arith.negf %89 : vector<2x192xf32>
    %91 = math.exp %90 : vector<2x192xf32>
    %cst_44 = arith.constant 1.000000e+00 : f32
    %92 = vector.broadcast %cst_44 : f32 to vector<2x192xf32>
    %93 = arith.addf %92, %91 : vector<2x192xf32>
    %94 = arith.divf %92, %93 : vector<2x192xf32>
    %95 = vector.extract_strided_slice %88 {offsets = [0, 192], sizes = [2, 64], strides = [1, 1]} : vector<2x256xf32> to vector<2x64xf32>
    %96 = math.tanh %95 : vector<2x64xf32>
    %97 = vector.extract_strided_slice %94 {offsets = [0, 0], sizes = [2, 64], strides = [1, 1]} : vector<2x192xf32> to vector<2x64xf32>
    %98 = vector.extract_strided_slice %94 {offsets = [0, 64], sizes = [2, 64], strides = [1, 1]} : vector<2x192xf32> to vector<2x64xf32>
    %99 = vector.extract_strided_slice %94 {offsets = [0, 128], sizes = [2, 64], strides = [1, 1]} : vector<2x192xf32> to vector<2x64xf32>
    %100 = arith.mulf %98, %51 : vector<2x64xf32>
    %101 = arith.mulf %97, %96 : vector<2x64xf32>
    %102 = arith.addf %100, %101 : vector<2x64xf32>
    %103 = math.tanh %102 : vector<2x64xf32>
    %104 = arith.mulf %99, %103 : vector<2x64xf32>
    %c0_45 = arith.constant 0 : index
    %c64 = arith.constant 64 : index
    %105 = vector.load %arg7[%c0_45, %c64] : memref<2x512xf32, #tpu.memory_space<vmem>>, vector<2x64xf32>
    tpu.vector_store %arg7[%c0_45, %c64], %104 {strides = array<i32>} : memref<2x512xf32, #tpu.memory_space<vmem>>, vector<2x64xf32>,
    %c0_46 = arith.constant 0 : index
    %c2 = arith.constant 2 : index
    %c0_47 = arith.constant 0 : index
    %106 = vector.load %arg0[%c0_46, %c2, %c0_47] : memref<2x8x16xf32, #tpu.memory_space<vmem>>, vector<2x1x16xf32>
    %107 = vector.shape_cast %106 : vector<2x1x16xf32> to vector<2x16xf32>
    %c0_48 = arith.constant 0 : index
    %c0_49 = arith.constant 0 : index
    %108 = vector.load %arg1[%c0_48, %c0_49] : memref<16x256xf32, #tpu.memory_space<vmem>>, vector<16x256xf32>
    %cst_50 = arith.constant dense<0.000000e+00> : vector<2x256xf32>
    %109 = tpu.matmul %107, %108, %cst_50 {dimension_numbers = #tpu.dot_dimension_numbers<[1], [0], [0], [1], [0, 0, 1, 1], [], []>} : vector<2x16xf32>, vector<16x256xf32>, vector<2x256xf32> -> vector<2x256xf32>
    %c0_51 = arith.constant 0 : index
    %c0_52 = arith.constant 0 : index
    %110 = vector.load %arg3[%c0_51, %c0_52] : memref<64x256xf32, #tpu.memory_space<vmem>>, vector<64x256xf32>
    %cst_53 = arith.constant dense<0.000000e+00> : vector<2x256xf32>
    %111 = tpu.matmul %80, %110, %cst_53 {dimension_numbers = #tpu.dot_dimension_numbers<[1], [0], [0], [1], [0, 0, 1, 1], [], []>} : vector<2x64xf32>, vector<64x256xf32>, vector<2x256xf32> -> vector<2x256xf32>
    %112 = arith.addf %109, %111 : vector<2x256xf32>
    %c0_54 = arith.constant 0 : index
    %c0_55 = arith.constant 0 : index
    %113 = vector.load %arg5[%c0_54, %c0_55] : memref<1x256xf32, #tpu.memory_space<vmem>>, vector<1x256xf32>
    %114 = vector.broadcast %113 : vector<1x256xf32> to vector<2x256xf32>
    %115 = arith.addf %112, %114 : vector<2x256xf32>
    %116 = vector.extract_strided_slice %115 {offsets = [0, 0], sizes = [2, 192], strides = [1, 1]} : vector<2x256xf32> to vector<2x192xf32>
    %117 = arith.negf %116 : vector<2x192xf32>
    %118 = math.exp %117 : vector<2x192xf32>
    %cst_56 = arith.constant 1.000000e+00 : f32
    %119 = vector.broadcast %cst_56 : f32 to vector<2x192xf32>
    %120 = arith.addf %119, %118 : vector<2x192xf32>
    %121 = arith.divf %119, %120 : vector<2x192xf32>
    %122 = vector.extract_strided_slice %115 {offsets = [0, 192], sizes = [2, 64], strides = [1, 1]} : vector<2x256xf32> to vector<2x64xf32>
    %123 = math.tanh %122 : vector<2x64xf32>
    %124 = vector.extract_strided_slice %121 {offsets = [0, 0], sizes = [2, 64], strides = [1, 1]} : vector<2x192xf32> to vector<2x64xf32>
    %125 = vector.extract_strided_slice %121 {offsets = [0, 64], sizes = [2, 64], strides = [1, 1]} : vector<2x192xf32> to vector<2x64xf32>
    %126 = vector.extract_strided_slice %121 {offsets = [0, 128], sizes = [2, 64], strides = [1, 1]} : vector<2x192xf32> to vector<2x64xf32>
    %127 = arith.mulf %125, %78 : vector<2x64xf32>
    %128 = arith.mulf %124, %123 : vector<2x64xf32>
    %129 = arith.addf %127, %128 : vector<2x64xf32>
    %130 = math.tanh %129 : vector<2x64xf32>
    %131 = arith.mulf %126, %130 : vector<2x64xf32>
    %c0_57 = arith.constant 0 : index
    %c0_58 = arith.constant 0 : index
    %132 = vector.load %arg2[%c0_57, %c0_58] : memref<64x256xf32, #tpu.memory_space<vmem>>, vector<64x256xf32>
    %cst_59 = arith.constant dense<0.000000e+00> : vector<2x256xf32>
    %133 = tpu.matmul %131, %132, %cst_59 {dimension_numbers = #tpu.dot_dimension_numbers<[1], [0], [0], [1], [0, 0, 1, 1], [], []>} : vector<2x64xf32>, vector<64x256xf32>, vector<2x256xf32> -> vector<2x256xf32>
    %c0_60 = arith.constant 0 : index
    %c0_61 = arith.constant 0 : index
    %134 = vector.load %arg4[%c0_60, %c0_61] : memref<64x256xf32, #tpu.memory_space<vmem>>, vector<64x256xf32>
    %cst_62 = arith.constant dense<0.000000e+00> : vector<2x256xf32>
    %135 = tpu.matmul %104, %134, %cst_62 {dimension_numbers = #tpu.dot_dimension_numbers<[1], [0], [0], [1], [0, 0, 1, 1], [], []>} : vector<2x64xf32>, vector<64x256xf32>, vector<2x256xf32> -> vector<2x256xf32>
    %136 = arith.addf %133, %135 : vector<2x256xf32>
    %c0_63 = arith.constant 0 : index
    %c0_64 = arith.constant 0 : index
    %137 = vector.load %arg6[%c0_63, %c0_64] : memref<1x256xf32, #tpu.memory_space<vmem>>, vector<1x256xf32>
    %138 = vector.broadcast %137 : vector<1x256xf32> to vector<2x256xf32>
    %139 = arith.addf %136, %138 : vector<2x256xf32>
    %140 = vector.extract_strided_slice %139 {offsets = [0, 0], sizes = [2, 192], strides = [1, 1]} : vector<2x256xf32> to vector<2x192xf32>
    %141 = arith.negf %140 : vector<2x192xf32>
    %142 = math.exp %141 : vector<2x192xf32>
    %cst_65 = arith.constant 1.000000e+00 : f32
    %143 = vector.broadcast %cst_65 : f32 to vector<2x192xf32>
    %144 = arith.addf %143, %142 : vector<2x192xf32>
    %145 = arith.divf %143, %144 : vector<2x192xf32>
    %146 = vector.extract_strided_slice %139 {offsets = [0, 192], sizes = [2, 64], strides = [1, 1]} : vector<2x256xf32> to vector<2x64xf32>
    %147 = math.tanh %146 : vector<2x64xf32>
    %148 = vector.extract_strided_slice %145 {offsets = [0, 0], sizes = [2, 64], strides = [1, 1]} : vector<2x192xf32> to vector<2x64xf32>
    %149 = vector.extract_strided_slice %145 {offsets = [0, 64], sizes = [2, 64], strides = [1, 1]} : vector<2x192xf32> to vector<2x64xf32>
    %150 = vector.extract_strided_slice %145 {offsets = [0, 128], sizes = [2, 64], strides = [1, 1]} : vector<2x192xf32> to vector<2x64xf32>
    %151 = arith.mulf %149, %102 : vector<2x64xf32>
    %152 = arith.mulf %148, %147 : vector<2x64xf32>
    %153 = arith.addf %151, %152 : vector<2x64xf32>
    %154 = math.tanh %153 : vector<2x64xf32>
    %155 = arith.mulf %150, %154 : vector<2x64xf32>
    %c0_66 = arith.constant 0 : index
    %c128 = arith.constant 128 : index
    %156 = vector.load %arg7[%c0_66, %c128] : memref<2x512xf32, #tpu.memory_space<vmem>>, vector<2x64xf32>
    tpu.vector_store %arg7[%c0_66, %c128], %155 {strides = array<i32>} : memref<2x512xf32, #tpu.memory_space<vmem>>, vector<2x64xf32>,
    %c0_67 = arith.constant 0 : index
    %c3 = arith.constant 3 : index
    %c0_68 = arith.constant 0 : index
    %157 = vector.load %arg0[%c0_67, %c3, %c0_68] : memref<2x8x16xf32, #tpu.memory_space<vmem>>, vector<2x1x16xf32>
    %158 = vector.shape_cast %157 : vector<2x1x16xf32> to vector<2x16xf32>
    %c0_69 = arith.constant 0 : index
    %c0_70 = arith.constant 0 : index
    %159 = vector.load %arg1[%c0_69, %c0_70] : memref<16x256xf32, #tpu.memory_space<vmem>>, vector<16x256xf32>
    %cst_71 = arith.constant dense<0.000000e+00> : vector<2x256xf32>
    %160 = tpu.matmul %158, %159, %cst_71 {dimension_numbers = #tpu.dot_dimension_numbers<[1], [0], [0], [1], [0, 0, 1, 1], [], []>} : vector<2x16xf32>, vector<16x256xf32>, vector<2x256xf32> -> vector<2x256xf32>
    %c0_72 = arith.constant 0 : index
    %c0_73 = arith.constant 0 : index
    %161 = vector.load %arg3[%c0_72, %c0_73] : memref<64x256xf32, #tpu.memory_space<vmem>>, vector<64x256xf32>
    %cst_74 = arith.constant dense<0.000000e+00> : vector<2x256xf32>
    %162 = tpu.matmul %131, %161, %cst_74 {dimension_numbers = #tpu.dot_dimension_numbers<[1], [0], [0], [1], [0, 0, 1, 1], [], []>} : vector<2x64xf32>, vector<64x256xf32>, vector<2x256xf32> -> vector<2x256xf32>
    %163 = arith.addf %160, %162 : vector<2x256xf32>
    %c0_75 = arith.constant 0 : index
    %c0_76 = arith.constant 0 : index
    %164 = vector.load %arg5[%c0_75, %c0_76] : memref<1x256xf32, #tpu.memory_space<vmem>>, vector<1x256xf32>
    %165 = vector.broadcast %164 : vector<1x256xf32> to vector<2x256xf32>
    %166 = arith.addf %163, %165 : vector<2x256xf32>
    %167 = vector.extract_strided_slice %166 {offsets = [0, 0], sizes = [2, 192], strides = [1, 1]} : vector<2x256xf32> to vector<2x192xf32>
    %168 = arith.negf %167 : vector<2x192xf32>
    %169 = math.exp %168 : vector<2x192xf32>
    %cst_77 = arith.constant 1.000000e+00 : f32
    %170 = vector.broadcast %cst_77 : f32 to vector<2x192xf32>
    %171 = arith.addf %170, %169 : vector<2x192xf32>
    %172 = arith.divf %170, %171 : vector<2x192xf32>
    %173 = vector.extract_strided_slice %166 {offsets = [0, 192], sizes = [2, 64], strides = [1, 1]} : vector<2x256xf32> to vector<2x64xf32>
    %174 = math.tanh %173 : vector<2x64xf32>
    %175 = vector.extract_strided_slice %172 {offsets = [0, 0], sizes = [2, 64], strides = [1, 1]} : vector<2x192xf32> to vector<2x64xf32>
    %176 = vector.extract_strided_slice %172 {offsets = [0, 64], sizes = [2, 64], strides = [1, 1]} : vector<2x192xf32> to vector<2x64xf32>
    %177 = vector.extract_strided_slice %172 {offsets = [0, 128], sizes = [2, 64], strides = [1, 1]} : vector<2x192xf32> to vector<2x64xf32>
    %178 = arith.mulf %176, %129 : vector<2x64xf32>
    %179 = arith.mulf %175, %174 : vector<2x64xf32>
    %180 = arith.addf %178, %179 : vector<2x64xf32>
    %181 = math.tanh %180 : vector<2x64xf32>
    %182 = arith.mulf %177, %181 : vector<2x64xf32>
    %c0_78 = arith.constant 0 : index
    %c0_79 = arith.constant 0 : index
    %183 = vector.load %arg2[%c0_78, %c0_79] : memref<64x256xf32, #tpu.memory_space<vmem>>, vector<64x256xf32>
    %cst_80 = arith.constant dense<0.000000e+00> : vector<2x256xf32>
    %184 = tpu.matmul %182, %183, %cst_80 {dimension_numbers = #tpu.dot_dimension_numbers<[1], [0], [0], [1], [0, 0, 1, 1], [], []>} : vector<2x64xf32>, vector<64x256xf32>, vector<2x256xf32> -> vector<2x256xf32>
    %c0_81 = arith.constant 0 : index
    %c0_82 = arith.constant 0 : index
    %185 = vector.load %arg4[%c0_81, %c0_82] : memref<64x256xf32, #tpu.memory_space<vmem>>, vector<64x256xf32>
    %cst_83 = arith.constant dense<0.000000e+00> : vector<2x256xf32>
    %186 = tpu.matmul %155, %185, %cst_83 {dimension_numbers = #tpu.dot_dimension_numbers<[1], [0], [0], [1], [0, 0, 1, 1], [], []>} : vector<2x64xf32>, vector<64x256xf32>, vector<2x256xf32> -> vector<2x256xf32>
    %187 = arith.addf %184, %186 : vector<2x256xf32>
    %c0_84 = arith.constant 0 : index
    %c0_85 = arith.constant 0 : index
    %188 = vector.load %arg6[%c0_84, %c0_85] : memref<1x256xf32, #tpu.memory_space<vmem>>, vector<1x256xf32>
    %189 = vector.broadcast %188 : vector<1x256xf32> to vector<2x256xf32>
    %190 = arith.addf %187, %189 : vector<2x256xf32>
    %191 = vector.extract_strided_slice %190 {offsets = [0, 0], sizes = [2, 192], strides = [1, 1]} : vector<2x256xf32> to vector<2x192xf32>
    %192 = arith.negf %191 : vector<2x192xf32>
    %193 = math.exp %192 : vector<2x192xf32>
    %cst_86 = arith.constant 1.000000e+00 : f32
    %194 = vector.broadcast %cst_86 : f32 to vector<2x192xf32>
    %195 = arith.addf %194, %193 : vector<2x192xf32>
    %196 = arith.divf %194, %195 : vector<2x192xf32>
    %197 = vector.extract_strided_slice %190 {offsets = [0, 192], sizes = [2, 64], strides = [1, 1]} : vector<2x256xf32> to vector<2x64xf32>
    %198 = math.tanh %197 : vector<2x64xf32>
    %199 = vector.extract_strided_slice %196 {offsets = [0, 0], sizes = [2, 64], strides = [1, 1]} : vector<2x192xf32> to vector<2x64xf32>
    %200 = vector.extract_strided_slice %196 {offsets = [0, 64], sizes = [2, 64], strides = [1, 1]} : vector<2x192xf32> to vector<2x64xf32>
    %201 = vector.extract_strided_slice %196 {offsets = [0, 128], sizes = [2, 64], strides = [1, 1]} : vector<2x192xf32> to vector<2x64xf32>
    %202 = arith.mulf %200, %153 : vector<2x64xf32>
    %203 = arith.mulf %199, %198 : vector<2x64xf32>
    %204 = arith.addf %202, %203 : vector<2x64xf32>
    %205 = math.tanh %204 : vector<2x64xf32>
    %206 = arith.mulf %201, %205 : vector<2x64xf32>
    %c0_87 = arith.constant 0 : index
    %c192 = arith.constant 192 : index
    %207 = vector.load %arg7[%c0_87, %c192] : memref<2x512xf32, #tpu.memory_space<vmem>>, vector<2x64xf32>
    tpu.vector_store %arg7[%c0_87, %c192], %206 {strides = array<i32>} : memref<2x512xf32, #tpu.memory_space<vmem>>, vector<2x64xf32>,
    %c0_88 = arith.constant 0 : index
    %c4 = arith.constant 4 : index
    %c0_89 = arith.constant 0 : index
    %208 = vector.load %arg0[%c0_88, %c4, %c0_89] : memref<2x8x16xf32, #tpu.memory_space<vmem>>, vector<2x1x16xf32>
    %209 = vector.shape_cast %208 : vector<2x1x16xf32> to vector<2x16xf32>
    %c0_90 = arith.constant 0 : index
    %c0_91 = arith.constant 0 : index
    %210 = vector.load %arg1[%c0_90, %c0_91] : memref<16x256xf32, #tpu.memory_space<vmem>>, vector<16x256xf32>
    %cst_92 = arith.constant dense<0.000000e+00> : vector<2x256xf32>
    %211 = tpu.matmul %209, %210, %cst_92 {dimension_numbers = #tpu.dot_dimension_numbers<[1], [0], [0], [1], [0, 0, 1, 1], [], []>} : vector<2x16xf32>, vector<16x256xf32>, vector<2x256xf32> -> vector<2x256xf32>
    %c0_93 = arith.constant 0 : index
    %c0_94 = arith.constant 0 : index
    %212 = vector.load %arg3[%c0_93, %c0_94] : memref<64x256xf32, #tpu.memory_space<vmem>>, vector<64x256xf32>
    %cst_95 = arith.constant dense<0.000000e+00> : vector<2x256xf32>
    %213 = tpu.matmul %182, %212, %cst_95 {dimension_numbers = #tpu.dot_dimension_numbers<[1], [0], [0], [1], [0, 0, 1, 1], [], []>} : vector<2x64xf32>, vector<64x256xf32>, vector<2x256xf32> -> vector<2x256xf32>
    %214 = arith.addf %211, %213 : vector<2x256xf32>
    %c0_96 = arith.constant 0 : index
    %c0_97 = arith.constant 0 : index
    %215 = vector.load %arg5[%c0_96, %c0_97] : memref<1x256xf32, #tpu.memory_space<vmem>>, vector<1x256xf32>
    %216 = vector.broadcast %215 : vector<1x256xf32> to vector<2x256xf32>
    %217 = arith.addf %214, %216 : vector<2x256xf32>
    %218 = vector.extract_strided_slice %217 {offsets = [0, 0], sizes = [2, 192], strides = [1, 1]} : vector<2x256xf32> to vector<2x192xf32>
    %219 = arith.negf %218 : vector<2x192xf32>
    %220 = math.exp %219 : vector<2x192xf32>
    %cst_98 = arith.constant 1.000000e+00 : f32
    %221 = vector.broadcast %cst_98 : f32 to vector<2x192xf32>
    %222 = arith.addf %221, %220 : vector<2x192xf32>
    %223 = arith.divf %221, %222 : vector<2x192xf32>
    %224 = vector.extract_strided_slice %217 {offsets = [0, 192], sizes = [2, 64], strides = [1, 1]} : vector<2x256xf32> to vector<2x64xf32>
    %225 = math.tanh %224 : vector<2x64xf32>
    %226 = vector.extract_strided_slice %223 {offsets = [0, 0], sizes = [2, 64], strides = [1, 1]} : vector<2x192xf32> to vector<2x64xf32>
    %227 = vector.extract_strided_slice %223 {offsets = [0, 64], sizes = [2, 64], strides = [1, 1]} : vector<2x192xf32> to vector<2x64xf32>
    %228 = vector.extract_strided_slice %223 {offsets = [0, 128], sizes = [2, 64], strides = [1, 1]} : vector<2x192xf32> to vector<2x64xf32>
    %229 = arith.mulf %227, %180 : vector<2x64xf32>
    %230 = arith.mulf %226, %225 : vector<2x64xf32>
    %231 = arith.addf %229, %230 : vector<2x64xf32>
    %232 = math.tanh %231 : vector<2x64xf32>
    %233 = arith.mulf %228, %232 : vector<2x64xf32>
    %c0_99 = arith.constant 0 : index
    %c0_100 = arith.constant 0 : index
    %234 = vector.load %arg2[%c0_99, %c0_100] : memref<64x256xf32, #tpu.memory_space<vmem>>, vector<64x256xf32>
    %cst_101 = arith.constant dense<0.000000e+00> : vector<2x256xf32>
    %235 = tpu.matmul %233, %234, %cst_101 {dimension_numbers = #tpu.dot_dimension_numbers<[1], [0], [0], [1], [0, 0, 1, 1], [], []>} : vector<2x64xf32>, vector<64x256xf32>, vector<2x256xf32> -> vector<2x256xf32>
    %c0_102 = arith.constant 0 : index
    %c0_103 = arith.constant 0 : index
    %236 = vector.load %arg4[%c0_102, %c0_103] : memref<64x256xf32, #tpu.memory_space<vmem>>, vector<64x256xf32>
    %cst_104 = arith.constant dense<0.000000e+00> : vector<2x256xf32>
    %237 = tpu.matmul %206, %236, %cst_104 {dimension_numbers = #tpu.dot_dimension_numbers<[1], [0], [0], [1], [0, 0, 1, 1], [], []>} : vector<2x64xf32>, vector<64x256xf32>, vector<2x256xf32> -> vector<2x256xf32>
    %238 = arith.addf %235, %237 : vector<2x256xf32>
    %c0_105 = arith.constant 0 : index
    %c0_106 = arith.constant 0 : index
    %239 = vector.load %arg6[%c0_105, %c0_106] : memref<1x256xf32, #tpu.memory_space<vmem>>, vector<1x256xf32>
    %240 = vector.broadcast %239 : vector<1x256xf32> to vector<2x256xf32>
    %241 = arith.addf %238, %240 : vector<2x256xf32>
    %242 = vector.extract_strided_slice %241 {offsets = [0, 0], sizes = [2, 192], strides = [1, 1]} : vector<2x256xf32> to vector<2x192xf32>
    %243 = arith.negf %242 : vector<2x192xf32>
    %244 = math.exp %243 : vector<2x192xf32>
    %cst_107 = arith.constant 1.000000e+00 : f32
    %245 = vector.broadcast %cst_107 : f32 to vector<2x192xf32>
    %246 = arith.addf %245, %244 : vector<2x192xf32>
    %247 = arith.divf %245, %246 : vector<2x192xf32>
    %248 = vector.extract_strided_slice %241 {offsets = [0, 192], sizes = [2, 64], strides = [1, 1]} : vector<2x256xf32> to vector<2x64xf32>
    %249 = math.tanh %248 : vector<2x64xf32>
    %250 = vector.extract_strided_slice %247 {offsets = [0, 0], sizes = [2, 64], strides = [1, 1]} : vector<2x192xf32> to vector<2x64xf32>
    %251 = vector.extract_strided_slice %247 {offsets = [0, 64], sizes = [2, 64], strides = [1, 1]} : vector<2x192xf32> to vector<2x64xf32>
    %252 = vector.extract_strided_slice %247 {offsets = [0, 128], sizes = [2, 64], strides = [1, 1]} : vector<2x192xf32> to vector<2x64xf32>
    %253 = arith.mulf %251, %204 : vector<2x64xf32>
    %254 = arith.mulf %250, %249 : vector<2x64xf32>
    %255 = arith.addf %253, %254 : vector<2x64xf32>
    %256 = math.tanh %255 : vector<2x64xf32>
    %257 = arith.mulf %252, %256 : vector<2x64xf32>
    %c0_108 = arith.constant 0 : index
    %c256 = arith.constant 256 : index
    %258 = vector.load %arg7[%c0_108, %c256] : memref<2x512xf32, #tpu.memory_space<vmem>>, vector<2x64xf32>
    tpu.vector_store %arg7[%c0_108, %c256], %257 {strides = array<i32>} : memref<2x512xf32, #tpu.memory_space<vmem>>, vector<2x64xf32>,
    %c0_109 = arith.constant 0 : index
    %c5 = arith.constant 5 : index
    %c0_110 = arith.constant 0 : index
    %259 = vector.load %arg0[%c0_109, %c5, %c0_110] : memref<2x8x16xf32, #tpu.memory_space<vmem>>, vector<2x1x16xf32>
    %260 = vector.shape_cast %259 : vector<2x1x16xf32> to vector<2x16xf32>
    %c0_111 = arith.constant 0 : index
    %c0_112 = arith.constant 0 : index
    %261 = vector.load %arg1[%c0_111, %c0_112] : memref<16x256xf32, #tpu.memory_space<vmem>>, vector<16x256xf32>
    %cst_113 = arith.constant dense<0.000000e+00> : vector<2x256xf32>
    %262 = tpu.matmul %260, %261, %cst_113 {dimension_numbers = #tpu.dot_dimension_numbers<[1], [0], [0], [1], [0, 0, 1, 1], [], []>} : vector<2x16xf32>, vector<16x256xf32>, vector<2x256xf32> -> vector<2x256xf32>
    %c0_114 = arith.constant 0 : index
    %c0_115 = arith.constant 0 : index
    %263 = vector.load %arg3[%c0_114, %c0_115] : memref<64x256xf32, #tpu.memory_space<vmem>>, vector<64x256xf32>
    %cst_116 = arith.constant dense<0.000000e+00> : vector<2x256xf32>
    %264 = tpu.matmul %233, %263, %cst_116 {dimension_numbers = #tpu.dot_dimension_numbers<[1], [0], [0], [1], [0, 0, 1, 1], [], []>} : vector<2x64xf32>, vector<64x256xf32>, vector<2x256xf32> -> vector<2x256xf32>
    %265 = arith.addf %262, %264 : vector<2x256xf32>
    %c0_117 = arith.constant 0 : index
    %c0_118 = arith.constant 0 : index
    %266 = vector.load %arg5[%c0_117, %c0_118] : memref<1x256xf32, #tpu.memory_space<vmem>>, vector<1x256xf32>
    %267 = vector.broadcast %266 : vector<1x256xf32> to vector<2x256xf32>
    %268 = arith.addf %265, %267 : vector<2x256xf32>
    %269 = vector.extract_strided_slice %268 {offsets = [0, 0], sizes = [2, 192], strides = [1, 1]} : vector<2x256xf32> to vector<2x192xf32>
    %270 = arith.negf %269 : vector<2x192xf32>
    %271 = math.exp %270 : vector<2x192xf32>
    %cst_119 = arith.constant 1.000000e+00 : f32
    %272 = vector.broadcast %cst_119 : f32 to vector<2x192xf32>
    %273 = arith.addf %272, %271 : vector<2x192xf32>
    %274 = arith.divf %272, %273 : vector<2x192xf32>
    %275 = vector.extract_strided_slice %268 {offsets = [0, 192], sizes = [2, 64], strides = [1, 1]} : vector<2x256xf32> to vector<2x64xf32>
    %276 = math.tanh %275 : vector<2x64xf32>
    %277 = vector.extract_strided_slice %274 {offsets = [0, 0], sizes = [2, 64], strides = [1, 1]} : vector<2x192xf32> to vector<2x64xf32>
    %278 = vector.extract_strided_slice %274 {offsets = [0, 64], sizes = [2, 64], strides = [1, 1]} : vector<2x192xf32> to vector<2x64xf32>
    %279 = vector.extract_strided_slice %274 {offsets = [0, 128], sizes = [2, 64], strides = [1, 1]} : vector<2x192xf32> to vector<2x64xf32>
    %280 = arith.mulf %278, %231 : vector<2x64xf32>
    %281 = arith.mulf %277, %276 : vector<2x64xf32>
    %282 = arith.addf %280, %281 : vector<2x64xf32>
    %283 = math.tanh %282 : vector<2x64xf32>
    %284 = arith.mulf %279, %283 : vector<2x64xf32>
    %c0_120 = arith.constant 0 : index
    %c0_121 = arith.constant 0 : index
    %285 = vector.load %arg2[%c0_120, %c0_121] : memref<64x256xf32, #tpu.memory_space<vmem>>, vector<64x256xf32>
    %cst_122 = arith.constant dense<0.000000e+00> : vector<2x256xf32>
    %286 = tpu.matmul %284, %285, %cst_122 {dimension_numbers = #tpu.dot_dimension_numbers<[1], [0], [0], [1], [0, 0, 1, 1], [], []>} : vector<2x64xf32>, vector<64x256xf32>, vector<2x256xf32> -> vector<2x256xf32>
    %c0_123 = arith.constant 0 : index
    %c0_124 = arith.constant 0 : index
    %287 = vector.load %arg4[%c0_123, %c0_124] : memref<64x256xf32, #tpu.memory_space<vmem>>, vector<64x256xf32>
    %cst_125 = arith.constant dense<0.000000e+00> : vector<2x256xf32>
    %288 = tpu.matmul %257, %287, %cst_125 {dimension_numbers = #tpu.dot_dimension_numbers<[1], [0], [0], [1], [0, 0, 1, 1], [], []>} : vector<2x64xf32>, vector<64x256xf32>, vector<2x256xf32> -> vector<2x256xf32>
    %289 = arith.addf %286, %288 : vector<2x256xf32>
    %c0_126 = arith.constant 0 : index
    %c0_127 = arith.constant 0 : index
    %290 = vector.load %arg6[%c0_126, %c0_127] : memref<1x256xf32, #tpu.memory_space<vmem>>, vector<1x256xf32>
    %291 = vector.broadcast %290 : vector<1x256xf32> to vector<2x256xf32>
    %292 = arith.addf %289, %291 : vector<2x256xf32>
    %293 = vector.extract_strided_slice %292 {offsets = [0, 0], sizes = [2, 192], strides = [1, 1]} : vector<2x256xf32> to vector<2x192xf32>
    %294 = arith.negf %293 : vector<2x192xf32>
    %295 = math.exp %294 : vector<2x192xf32>
    %cst_128 = arith.constant 1.000000e+00 : f32
    %296 = vector.broadcast %cst_128 : f32 to vector<2x192xf32>
    %297 = arith.addf %296, %295 : vector<2x192xf32>
    %298 = arith.divf %296, %297 : vector<2x192xf32>
    %299 = vector.extract_strided_slice %292 {offsets = [0, 192], sizes = [2, 64], strides = [1, 1]} : vector<2x256xf32> to vector<2x64xf32>
    %300 = math.tanh %299 : vector<2x64xf32>
    %301 = vector.extract_strided_slice %298 {offsets = [0, 0], sizes = [2, 64], strides = [1, 1]} : vector<2x192xf32> to vector<2x64xf32>
    %302 = vector.extract_strided_slice %298 {offsets = [0, 64], sizes = [2, 64], strides = [1, 1]} : vector<2x192xf32> to vector<2x64xf32>
    %303 = vector.extract_strided_slice %298 {offsets = [0, 128], sizes = [2, 64], strides = [1, 1]} : vector<2x192xf32> to vector<2x64xf32>
    %304 = arith.mulf %302, %255 : vector<2x64xf32>
    %305 = arith.mulf %301, %300 : vector<2x64xf32>
    %306 = arith.addf %304, %305 : vector<2x64xf32>
    %307 = math.tanh %306 : vector<2x64xf32>
    %308 = arith.mulf %303, %307 : vector<2x64xf32>
    %c0_129 = arith.constant 0 : index
    %c320 = arith.constant 320 : index
    %309 = vector.load %arg7[%c0_129, %c320] : memref<2x512xf32, #tpu.memory_space<vmem>>, vector<2x64xf32>
    tpu.vector_store %arg7[%c0_129, %c320], %308 {strides = array<i32>} : memref<2x512xf32, #tpu.memory_space<vmem>>, vector<2x64xf32>,
    %c0_130 = arith.constant 0 : index
    %c6 = arith.constant 6 : index
    %c0_131 = arith.constant 0 : index
    %310 = vector.load %arg0[%c0_130, %c6, %c0_131] : memref<2x8x16xf32, #tpu.memory_space<vmem>>, vector<2x1x16xf32>
    %311 = vector.shape_cast %310 : vector<2x1x16xf32> to vector<2x16xf32>
    %c0_132 = arith.constant 0 : index
    %c0_133 = arith.constant 0 : index
    %312 = vector.load %arg1[%c0_132, %c0_133] : memref<16x256xf32, #tpu.memory_space<vmem>>, vector<16x256xf32>
    %cst_134 = arith.constant dense<0.000000e+00> : vector<2x256xf32>
    %313 = tpu.matmul %311, %312, %cst_134 {dimension_numbers = #tpu.dot_dimension_numbers<[1], [0], [0], [1], [0, 0, 1, 1], [], []>} : vector<2x16xf32>, vector<16x256xf32>, vector<2x256xf32> -> vector<2x256xf32>
    %c0_135 = arith.constant 0 : index
    %c0_136 = arith.constant 0 : index
    %314 = vector.load %arg3[%c0_135, %c0_136] : memref<64x256xf32, #tpu.memory_space<vmem>>, vector<64x256xf32>
    %cst_137 = arith.constant dense<0.000000e+00> : vector<2x256xf32>
    %315 = tpu.matmul %284, %314, %cst_137 {dimension_numbers = #tpu.dot_dimension_numbers<[1], [0], [0], [1], [0, 0, 1, 1], [], []>} : vector<2x64xf32>, vector<64x256xf32>, vector<2x256xf32> -> vector<2x256xf32>
    %316 = arith.addf %313, %315 : vector<2x256xf32>
    %c0_138 = arith.constant 0 : index
    %c0_139 = arith.constant 0 : index
    %317 = vector.load %arg5[%c0_138, %c0_139] : memref<1x256xf32, #tpu.memory_space<vmem>>, vector<1x256xf32>
    %318 = vector.broadcast %317 : vector<1x256xf32> to vector<2x256xf32>
    %319 = arith.addf %316, %318 : vector<2x256xf32>
    %320 = vector.extract_strided_slice %319 {offsets = [0, 0], sizes = [2, 192], strides = [1, 1]} : vector<2x256xf32> to vector<2x192xf32>
    %321 = arith.negf %320 : vector<2x192xf32>
    %322 = math.exp %321 : vector<2x192xf32>
    %cst_140 = arith.constant 1.000000e+00 : f32
    %323 = vector.broadcast %cst_140 : f32 to vector<2x192xf32>
    %324 = arith.addf %323, %322 : vector<2x192xf32>
    %325 = arith.divf %323, %324 : vector<2x192xf32>
    %326 = vector.extract_strided_slice %319 {offsets = [0, 192], sizes = [2, 64], strides = [1, 1]} : vector<2x256xf32> to vector<2x64xf32>
    %327 = math.tanh %326 : vector<2x64xf32>
    %328 = vector.extract_strided_slice %325 {offsets = [0, 0], sizes = [2, 64], strides = [1, 1]} : vector<2x192xf32> to vector<2x64xf32>
    %329 = vector.extract_strided_slice %325 {offsets = [0, 64], sizes = [2, 64], strides = [1, 1]} : vector<2x192xf32> to vector<2x64xf32>
    %330 = vector.extract_strided_slice %325 {offsets = [0, 128], sizes = [2, 64], strides = [1, 1]} : vector<2x192xf32> to vector<2x64xf32>
    %331 = arith.mulf %329, %282 : vector<2x64xf32>
    %332 = arith.mulf %328, %327 : vector<2x64xf32>
    %333 = arith.addf %331, %332 : vector<2x64xf32>
    %334 = math.tanh %333 : vector<2x64xf32>
    %335 = arith.mulf %330, %334 : vector<2x64xf32>
    %c0_141 = arith.constant 0 : index
    %c0_142 = arith.constant 0 : index
    %336 = vector.load %arg2[%c0_141, %c0_142] : memref<64x256xf32, #tpu.memory_space<vmem>>, vector<64x256xf32>
    %cst_143 = arith.constant dense<0.000000e+00> : vector<2x256xf32>
    %337 = tpu.matmul %335, %336, %cst_143 {dimension_numbers = #tpu.dot_dimension_numbers<[1], [0], [0], [1], [0, 0, 1, 1], [], []>} : vector<2x64xf32>, vector<64x256xf32>, vector<2x256xf32> -> vector<2x256xf32>
    %c0_144 = arith.constant 0 : index
    %c0_145 = arith.constant 0 : index
    %338 = vector.load %arg4[%c0_144, %c0_145] : memref<64x256xf32, #tpu.memory_space<vmem>>, vector<64x256xf32>
    %cst_146 = arith.constant dense<0.000000e+00> : vector<2x256xf32>
    %339 = tpu.matmul %308, %338, %cst_146 {dimension_numbers = #tpu.dot_dimension_numbers<[1], [0], [0], [1], [0, 0, 1, 1], [], []>} : vector<2x64xf32>, vector<64x256xf32>, vector<2x256xf32> -> vector<2x256xf32>
    %340 = arith.addf %337, %339 : vector<2x256xf32>
    %c0_147 = arith.constant 0 : index
    %c0_148 = arith.constant 0 : index
    %341 = vector.load %arg6[%c0_147, %c0_148] : memref<1x256xf32, #tpu.memory_space<vmem>>, vector<1x256xf32>
    %342 = vector.broadcast %341 : vector<1x256xf32> to vector<2x256xf32>
    %343 = arith.addf %340, %342 : vector<2x256xf32>
    %344 = vector.extract_strided_slice %343 {offsets = [0, 0], sizes = [2, 192], strides = [1, 1]} : vector<2x256xf32> to vector<2x192xf32>
    %345 = arith.negf %344 : vector<2x192xf32>
    %346 = math.exp %345 : vector<2x192xf32>
    %cst_149 = arith.constant 1.000000e+00 : f32
    %347 = vector.broadcast %cst_149 : f32 to vector<2x192xf32>
    %348 = arith.addf %347, %346 : vector<2x192xf32>
    %349 = arith.divf %347, %348 : vector<2x192xf32>
    %350 = vector.extract_strided_slice %343 {offsets = [0, 192], sizes = [2, 64], strides = [1, 1]} : vector<2x256xf32> to vector<2x64xf32>
    %351 = math.tanh %350 : vector<2x64xf32>
    %352 = vector.extract_strided_slice %349 {offsets = [0, 0], sizes = [2, 64], strides = [1, 1]} : vector<2x192xf32> to vector<2x64xf32>
    %353 = vector.extract_strided_slice %349 {offsets = [0, 64], sizes = [2, 64], strides = [1, 1]} : vector<2x192xf32> to vector<2x64xf32>
    %354 = vector.extract_strided_slice %349 {offsets = [0, 128], sizes = [2, 64], strides = [1, 1]} : vector<2x192xf32> to vector<2x64xf32>
    %355 = arith.mulf %353, %306 : vector<2x64xf32>
    %356 = arith.mulf %352, %351 : vector<2x64xf32>
    %357 = arith.addf %355, %356 : vector<2x64xf32>
    %358 = math.tanh %357 : vector<2x64xf32>
    %359 = arith.mulf %354, %358 : vector<2x64xf32>
    %c0_150 = arith.constant 0 : index
    %c384 = arith.constant 384 : index
    %360 = vector.load %arg7[%c0_150, %c384] : memref<2x512xf32, #tpu.memory_space<vmem>>, vector<2x64xf32>
    tpu.vector_store %arg7[%c0_150, %c384], %359 {strides = array<i32>} : memref<2x512xf32, #tpu.memory_space<vmem>>, vector<2x64xf32>,
    %c0_151 = arith.constant 0 : index
    %c7 = arith.constant 7 : index
    %c0_152 = arith.constant 0 : index
    %361 = vector.load %arg0[%c0_151, %c7, %c0_152] : memref<2x8x16xf32, #tpu.memory_space<vmem>>, vector<2x1x16xf32>
    %362 = vector.shape_cast %361 : vector<2x1x16xf32> to vector<2x16xf32>
    %c0_153 = arith.constant 0 : index
    %c0_154 = arith.constant 0 : index
    %363 = vector.load %arg1[%c0_153, %c0_154] : memref<16x256xf32, #tpu.memory_space<vmem>>, vector<16x256xf32>
    %cst_155 = arith.constant dense<0.000000e+00> : vector<2x256xf32>
    %364 = tpu.matmul %362, %363, %cst_155 {dimension_numbers = #tpu.dot_dimension_numbers<[1], [0], [0], [1], [0, 0, 1, 1], [], []>} : vector<2x16xf32>, vector<16x256xf32>, vector<2x256xf32> -> vector<2x256xf32>
    %c0_156 = arith.constant 0 : index
    %c0_157 = arith.constant 0 : index
    %365 = vector.load %arg3[%c0_156, %c0_157] : memref<64x256xf32, #tpu.memory_space<vmem>>, vector<64x256xf32>
    %cst_158 = arith.constant dense<0.000000e+00> : vector<2x256xf32>
    %366 = tpu.matmul %335, %365, %cst_158 {dimension_numbers = #tpu.dot_dimension_numbers<[1], [0], [0], [1], [0, 0, 1, 1], [], []>} : vector<2x64xf32>, vector<64x256xf32>, vector<2x256xf32> -> vector<2x256xf32>
    %367 = arith.addf %364, %366 : vector<2x256xf32>
    %c0_159 = arith.constant 0 : index
    %c0_160 = arith.constant 0 : index
    %368 = vector.load %arg5[%c0_159, %c0_160] : memref<1x256xf32, #tpu.memory_space<vmem>>, vector<1x256xf32>
    %369 = vector.broadcast %368 : vector<1x256xf32> to vector<2x256xf32>
    %370 = arith.addf %367, %369 : vector<2x256xf32>
    %371 = vector.extract_strided_slice %370 {offsets = [0, 0], sizes = [2, 192], strides = [1, 1]} : vector<2x256xf32> to vector<2x192xf32>
    %372 = arith.negf %371 : vector<2x192xf32>
    %373 = math.exp %372 : vector<2x192xf32>
    %cst_161 = arith.constant 1.000000e+00 : f32
    %374 = vector.broadcast %cst_161 : f32 to vector<2x192xf32>
    %375 = arith.addf %374, %373 : vector<2x192xf32>
    %376 = arith.divf %374, %375 : vector<2x192xf32>
    %377 = vector.extract_strided_slice %370 {offsets = [0, 192], sizes = [2, 64], strides = [1, 1]} : vector<2x256xf32> to vector<2x64xf32>
    %378 = math.tanh %377 : vector<2x64xf32>
    %379 = vector.extract_strided_slice %376 {offsets = [0, 0], sizes = [2, 64], strides = [1, 1]} : vector<2x192xf32> to vector<2x64xf32>
    %380 = vector.extract_strided_slice %376 {offsets = [0, 64], sizes = [2, 64], strides = [1, 1]} : vector<2x192xf32> to vector<2x64xf32>
    %381 = vector.extract_strided_slice %376 {offsets = [0, 128], sizes = [2, 64], strides = [1, 1]} : vector<2x192xf32> to vector<2x64xf32>
    %382 = arith.mulf %380, %333 : vector<2x64xf32>
    %383 = arith.mulf %379, %378 : vector<2x64xf32>
    %384 = arith.addf %382, %383 : vector<2x64xf32>
    %385 = math.tanh %384 : vector<2x64xf32>
    %386 = arith.mulf %381, %385 : vector<2x64xf32>
    %c0_162 = arith.constant 0 : index
    %c0_163 = arith.constant 0 : index
    %387 = vector.load %arg2[%c0_162, %c0_163] : memref<64x256xf32, #tpu.memory_space<vmem>>, vector<64x256xf32>
    %cst_164 = arith.constant dense<0.000000e+00> : vector<2x256xf32>
    %388 = tpu.matmul %386, %387, %cst_164 {dimension_numbers = #tpu.dot_dimension_numbers<[1], [0], [0], [1], [0, 0, 1, 1], [], []>} : vector<2x64xf32>, vector<64x256xf32>, vector<2x256xf32> -> vector<2x256xf32>
    %c0_165 = arith.constant 0 : index
    %c0_166 = arith.constant 0 : index
    %389 = vector.load %arg4[%c0_165, %c0_166] : memref<64x256xf32, #tpu.memory_space<vmem>>, vector<64x256xf32>
    %cst_167 = arith.constant dense<0.000000e+00> : vector<2x256xf32>
    %390 = tpu.matmul %359, %389, %cst_167 {dimension_numbers = #tpu.dot_dimension_numbers<[1], [0], [0], [1], [0, 0, 1, 1], [], []>} : vector<2x64xf32>, vector<64x256xf32>, vector<2x256xf32> -> vector<2x256xf32>
    %391 = arith.addf %388, %390 : vector<2x256xf32>
    %c0_168 = arith.constant 0 : index
    %c0_169 = arith.constant 0 : index
    %392 = vector.load %arg6[%c0_168, %c0_169] : memref<1x256xf32, #tpu.memory_space<vmem>>, vector<1x256xf32>
    %393 = vector.broadcast %392 : vector<1x256xf32> to vector<2x256xf32>
    %394 = arith.addf %391, %393 : vector<2x256xf32>
    %395 = vector.extract_strided_slice %394 {offsets = [0, 0], sizes = [2, 192], strides = [1, 1]} : vector<2x256xf32> to vector<2x192xf32>
    %396 = arith.negf %395 : vector<2x192xf32>
    %397 = math.exp %396 : vector<2x192xf32>
    %cst_170 = arith.constant 1.000000e+00 : f32
    %398 = vector.broadcast %cst_170 : f32 to vector<2x192xf32>
    %399 = arith.addf %398, %397 : vector<2x192xf32>
    %400 = arith.divf %398, %399 : vector<2x192xf32>
    %401 = vector.extract_strided_slice %394 {offsets = [0, 192], sizes = [2, 64], strides = [1, 1]} : vector<2x256xf32> to vector<2x64xf32>
    %402 = math.tanh %401 : vector<2x64xf32>
    %403 = vector.extract_strided_slice %400 {offsets = [0, 0], sizes = [2, 64], strides = [1, 1]} : vector<2x192xf32> to vector<2x64xf32>
    %404 = vector.extract_strided_slice %400 {offsets = [0, 64], sizes = [2, 64], strides = [1, 1]} : vector<2x192xf32> to vector<2x64xf32>
    %405 = vector.extract_strided_slice %400 {offsets = [0, 128], sizes = [2, 64], strides = [1, 1]} : vector<2x192xf32> to vector<2x64xf32>
    %406 = arith.mulf %404, %357 : vector<2x64xf32>
    %407 = arith.mulf %403, %402 : vector<2x64xf32>
    %408 = arith.addf %406, %407 : vector<2x64xf32>
    %409 = math.tanh %408 : vector<2x64xf32>
    %410 = arith.mulf %405, %409 : vector<2x64xf32>
    %c0_171 = arith.constant 0 : index
    %c448 = arith.constant 448 : index
    %411 = vector.load %arg7[%c0_171, %c448] : memref<2x512xf32, #tpu.memory_space<vmem>>, vector<2x64xf32>
    tpu.vector_store %arg7[%c0_171, %c448], %410 {strides = array<i32>} : memref<2x512xf32, #tpu.memory_space<vmem>>, vector<2x64xf32>,
    return
  }
}

</mosaic_0001>

<bundles_post_ra>
// kernel: custom-call
= control target key start
LH: loop header
LB: loop body
LE: loop exit
PB: predicated region body
PF: predicated region fallthrough
CT: control target
= control target key end

     0   :  { %s6_s0 = inlined_call_operand.vmem [shape: f32[2,8,4], index: 0, kind: output, shape index: {}]  }

// kernel: a_call__.1
= control target key start
LH: loop header
LB: loop body
LE: loop exit
PB: predicated region body
PF: predicated region fallthrough
CT: control target
= control target key end

     0   :  { %12 = vsyncpa [#allocation3], 0  ;;  %s5235_s0 = inlined_call_operand.vmem [shape: f32[2,8,16], index: 0, kind: input, shape index: {}]   ;;  %s5236_s1 = inlined_call_operand.vmem [shape: f32[16,256], index: 1, kind: input, shape index: {}]   ;;  %s5237_s2 = inlined_call_operand.hbm [shape: f32[64,256], index: 2, kind: input, shape index: {}]   ;;  %s5238_s3 = inlined_call_operand.hbm [shape: f32[64,256], index: 3, kind: input, shape index: {}]   ;;  %s5239_s4 = inlined_call_operand.vmem [shape: f32[64,256], index: 4, kind: input, shape index: {}]   ;;  %s5240_s5 = inlined_call_operand.vmem [shape: f32[1,256], index: 5, kind: input, shape index: {}]   ;;  %s5241_s6 = inlined_call_operand.vmem [shape: f32[1,256], index: 6, kind: input, shape index: {}]   ;;  %s5242_s7 = inlined_call_operand.vmem [shape: f32[2,512], index: 7, kind: output, shape index: {}]  }
   0x1   :  { %13 = vsyncpa [#allocation5], 0  ;;  %s3923_s24 = smov [#allocation2]  }
   0x2   :  { %s23_s25 = sshll.u32 %s3923_s24, 4  ;;  %s24_s25 = int_to_ptr.vmem [resolvable:$true] %s23_s25 }
   0x3   :  { %s3887_s26 = scalar_lea.vmem %s24_s25, 2048  ;;  %p3892_p1 = scmp.lt.s32.totalorder %s24_s25, %s24_s25 }
   0x4   :  { %p3888_p0 = scmp.ne.s32.totalorder %s24_s25, %s3887_s26  ;;  %p3893_p2 = scmp.lt.s32.totalorder %s3887_s26, %s3887_s26 }
   0x6   :  { %p3894_p3 = por %p3893_p2, %p3892_p1 }
   0x8   :  { %p3895_p4 = pnand %p3894_p3, %p3888_p0 }
   0xa   :  { %3898 = shalt.err (!%p3895_p4)
}
   0xb   :  { %s3924_s27 = smov 256   ;;  %s3925_s28 = smov 16  }
   0xc   :  { %29 = dma.hbm_to_vmem [thread:$0]  %s5237_s2, 2048, %s24_s25, [#allocation3], %s3924_s27, %s3924_s27, %s3925_s28  }
   0xd   :  { %s3926_s8 = smov [#allocation4]  }
   0xe   :  { %s35_s9 = sshll.u32 %s3926_s8, 4  ;;  %s36_s9 = int_to_ptr.vmem [resolvable:$true] %s35_s9 }
   0xf   :  { %s3907_s10 = scalar_lea.vmem %s36_s9, 2048  ;;  %p3912_p6 = scmp.lt.s32.totalorder %s36_s9, %s36_s9 }
  0x10   :  { %p3908_p5 = scmp.ne.s32.totalorder %s36_s9, %s3907_s10  ;;  %p3913_p7 = scmp.lt.s32.totalorder %s3907_s10, %s3907_s10 }
  0x12   :  { %p3914_p8 = por %p3913_p7, %p3912_p6 }
  0x14   :  { %p3915_p9 = pnand %p3914_p8, %p3908_p5 }
  0x16   :  { %3918 = shalt.err (!%p3915_p9)
}
  0x17   :  { %41 = dma.hbm_to_vmem [thread:$0]  %s5238_s3, 2048, %s36_s9, [#allocation5], %s3924_s27, %s3924_s27, %s3925_s28  }
  0x18   :  { %3919 = dma.done.wait [#allocation3], 2048  }
  0x19   :  { %3920 = vsyncadd [#allocation3], 4294965248 }
  0x1a   :  { %3921 = dma.done.wait [#allocation5], 2048  }
  0x1b   :  { %3922 = vsyncadd [#allocation5], 4294965248  ;;  %v5243_v0 = vmov 0.0   ;;  %v3978_v1 = vld [vmem:[#allocation4 + $0x78] sm:$0xff]  ;;  %v3980_v2 = vld [vmem:[#allocation4 + $0x70] sm:$0xff]  ;;  %vm154_vm0 = vcmask 1041409   ;;  %v232_v25 = vlaneseq }
  0x1c   :  { %223 = vmatprep.mubr.f32.mxu1 %v5243_v0  ;;  %144 = vmatprep.mubr.f32.mxu0 %v5243_v0  ;;  %5272 = vst [vmem:[#allocation8_spill] sm:$0xff] %v3978_v1  ;;  %v3982_v3 = vld [vmem:[#allocation4 + $0x68] sm:$0xff]  ;;  %v3985_v4 = vld [vmem:[#allocation4 + $0x60] sm:$0xff]  ;;  %v3988_v5 = vld [vmem:[#allocation4 + $0x58] sm:$0xff]  ;;  %vm156_vm1 = vcmask 130048   ;;  %s3928_s25 = smov 64  }
  0x1d   :  { %96 = vmatprep.subr.mxu0 %v3978_v1  ;;  %v3991_v6 = vld [vmem:[#allocation4 + $0x50] sm:$0xff]  ;;  %v3996_v7 = vld [vmem:[%s5236_s1 + $0x18] sm:$0xff]  ;;  %v3999_v8 = vld [vmem:[#allocation4 + $0x48] sm:$0xff]  ;;  %v4061_v26 = vshrl.u32 %v232_v25, 7  ;;  %vm76_vm2 = vcmask 523264   ;;  %vm495_vm3 = vcmask 517120  }
  0x1e   :  { %97 = vmatpush1.msra.mxu0 %v3980_v2  ;;  %187 = vmatprep.subr.mxu1 %v3996_v7  ;;  %v4005_v9 = vld [vmem:[%s5236_s1 + $0x10] sm:$0xff]  ;;  %v4008_v10 = vld [vmem:[#allocation4 + $0x40] sm:$0xff]  ;;  %v4014_v11 = vld [vmem:[%s5236_s1 + $0x8] sm:$0xff]  ;;  %vm946_vm4 = vcmask 1041920  }
  0x1f   :  { %98 = vmatprep.subr.mxu0 %v3982_v3  ;;  %188 = vmatpush1.msra.mxu1 %v4005_v9  ;;  %v4019_v12 = vld [vmem:[%s5236_s1] sm:$0xff]  ;;  %v4022_v13 = vld [vmem:[#allocation4 + $0x38] sm:$0xff]  ;;  %v55_v15 = vld [vmem:[%s5235_s0 + $0x8] sm:$0x1]  ;;  %5274 = vst [vmem:[#allocation10_spill] sm:$0xff] %v4061_v26  ;;  %v4064_v27 = vsub.s32 0, %v4061_v26 }
  0x20   :  { %99 = vmatpush1.msra.mxu0 %v3985_v4  ;;  %189 = vmatprep.subr.mxu1 %v4014_v11  ;;  %v54_v14 = vld [vmem:[%s5235_s0] sm:$0x1]  ;;  %v4032_v16 = vld [vmem:[#allocation4 + $0x30] sm:$0xff]  ;;  %v153_v17 = vrot.slane %v55_v15, 7  ;;  %v4036_v18 = vld [vmem:[#allocation4 + $0x28] sm:$0xff]  ;;  %v4070_v29 = vsub.s32 1, %v4061_v26 }
  0x21   :  { %100 = vmatprep.subr.mxu0 %v3988_v5  ;;  %190 = vmatpush1.msra.mxu1 %v4019_v12  ;;  %v4039_v19 = vld [vmem:[#allocation4 + $0x20] sm:$0xff]  ;;  %v4043_v21 = vld [vmem:[#allocation4 + $0x18] sm:$0xff]  ;;  %v4047_v22 = vld [vmem:[#allocation4 + $0x10] sm:$0xff] }
  0x22   :  { %101 = vmatpush1.msra.mxu0 %v3991_v6  ;;  %v155_v20 = vsel %vm154_vm0, %v153_v17, %v54_v14  ;;  %v4051_v23 = vld [vmem:[#allocation4 + $0x8] sm:$0xff]  ;;  %v4054_v24 = vld [vmem:[#allocation4] sm:$0xff]  ;;  %v4085_v47 = vld [vmem:[%s5239_s4 + $0x78] sm:$0xff] }
  0x23   :  { %102 = vmatprep.subr.mxu0 %v3999_v8  ;;  %3618 = vmatmul.mubr.msk.f32.vlgmr.msra.gmra.mxu1 %vm156_vm1, %v155_v20  ;;  %5273 = vst [vmem:[#allocation9_spill] sm:$0xff] %v4054_v24  ;;  %v230_v28 = vld [vmem:[%s5240_s5] sm:$0x3]  ;;  %v4090_v48 = vld [vmem:[%s5239_s4 + $0x70] sm:$0xff]  ;;  %v4095_v49 = vld [vmem:[%s5239_s4 + $0x68] sm:$0xff] }
  0x24   :  { %103 = vmatpush1.msra.mxu0 %v4008_v10  ;;  %370 = vmatprep.mubr.f32.mxu1 %v5243_v0  ;;  %v235_v31 = vrot.slane %v230_v28, %v4064_v27  ;;  %v239_v34 = vrot.slane %v230_v28, %v4070_v29  ;;  %v4101_v50 = vld [vmem:[%s5239_s4 + $0x60] sm:$0xff]  ;;  %v4107_v51 = vld [vmem:[%s5239_s4 + $0x58] sm:$0xff]  ;;  %v4113_v52 = vld [vmem:[%s5239_s4 + $0x50] sm:$0xff] }
  0x25   :  { %104 = vmatprep.subr.mxu0 %v4022_v13  ;;  %322 = vmatprep.subr.mxu1 %v4085_v47  ;;  %v4119_v53 = vld [vmem:[%s5239_s4 + $0x48] sm:$0xff]  ;;  %v4125_v54 = vld [vmem:[%s5239_s4 + $0x40] sm:$0xff]  ;;  %v4127_v55 = vld [vmem:[#allocation2 + $0x78] sm:$0xff] }
  0x26   :  { %105 = vmatpush1.msra.mxu0 %v4032_v16  ;;  %323 = vmatpush1.msra.mxu1 %v4090_v48  ;;  %5275 = vst [vmem:[#allocation11_spill] sm:$0xff] %v4127_v55  ;;  %v4129_v56 = vld [vmem:[#allocation2 + $0x70] sm:$0xff]  ;;  %v4135_v57 = vld [vmem:[%s5239_s4 + $0x38] sm:$0xff]  ;;  %v4138_v58 = vld [vmem:[#allocation2 + $0x68] sm:$0xff] }
  0x27   :  { %106 = vmatprep.subr.mxu0 %v4036_v18  ;;  %324 = vmatprep.subr.mxu1 %v4095_v49  ;;  %v4140_v59 = vld [vmem:[#allocation2 + $0x60] sm:$0xff]  ;;  %v4146_v60 = vld [vmem:[%s5239_s4 + $0x30] sm:$0xff]  ;;  %v4149_v61 = vld [vmem:[#allocation2 + $0x58] sm:$0xff] }
  0x28   :  { %107 = vmatpush1.msra.mxu0 %v4039_v19  ;;  %325 = vmatpush1.msra.mxu1 %v4101_v50  ;;  %v4155_v62 = vld [vmem:[%s5239_s4 + $0x28] sm:$0xff]  ;;  %v4158_v63 = vld [vmem:[#allocation2 + $0x50] sm:$0xff]  ;;  %v4164_v14 = vld [vmem:[%s5239_s4 + $0x20] sm:$0xff] }
  0x29   :  { %108 = vmatprep.subr.mxu0 %v4043_v21  ;;  %326 = vmatprep.subr.mxu1 %v4107_v51  ;;  %v4167_v15 = vld [vmem:[#allocation2 + $0x48] sm:$0xff]  ;;  %v4173_v17 = vld [vmem:[%s5239_s4 + $0x18] sm:$0xff]  ;;  %v4176_v20 = vld [vmem:[#allocation2 + $0x40] sm:$0xff] }
  0x2a   :  { %109 = vmatpush1.msra.mxu0 %v4047_v22  ;;  %327 = vmatpush1.msra.mxu1 %v4113_v52  ;;  %5276 = vst [vmem:[#allocation12_spill] sm:$0xff] %v4176_v20  ;;  %v4182_v25 = vld [vmem:[%s5239_s4 + $0x10] sm:$0xff]  ;;  %v4185_v28 = vld [vmem:[#allocation2 + $0x38] sm:$0xff] }
  0x2b   :  { %110 = vmatprep.subr.mxu0 %v4051_v23  ;;  %328 = vmatprep.subr.mxu1 %v4119_v53  ;;  %5277 = vst [vmem:[#allocation13_spill] sm:$0xff] %v4185_v28 }
  0x2c   :  { %111 = vmatpush1.msra.mxu0 %v4054_v24  ;;  %329 = vmatpush1.msra.mxu1 %v4125_v54 }
  0x2d   :  { %145 = vmatmul.mubr.f32.vlgmr.msra.gmra.mxu0 %v5243_v0  ;;  %396 = vmatprep.subr.mxu0 %v4127_v55 }
  0x2e   :  { %444 = vmatprep.mubr.f32.mxu0 %v5243_v0  ;;  %397 = vmatpush1.msra.mxu0 %v4129_v56 }
  0x2f   :  { %398 = vmatprep.subr.mxu0 %v4138_v58  ;;  %330 = vmatprep.subr.mxu1 %v4135_v57 }
  0x30   :  { %399 = vmatpush1.msra.mxu0 %v4140_v59  ;;  %331 = vmatpush1.msra.mxu1 %v4146_v60 }
  0x31   :  { %400 = vmatprep.subr.mxu0 %v4149_v61  ;;  %332 = vmatprep.subr.mxu1 %v4155_v62 }
  0x32   :  { %401 = vmatpush1.msra.mxu0 %v4158_v63  ;;  %333 = vmatpush1.msra.mxu1 %v4164_v14 }
  0x33   :  { %402 = vmatprep.subr.mxu0 %v4167_v15  ;;  %334 = vmatprep.subr.mxu1 %v4173_v17 }
  0x34   :  { %403 = vmatpush1.msra.mxu0 %v4176_v20  ;;  %335 = vmatpush1.msra.mxu1 %v4182_v25 }
  0x35   :  { %404 = vmatprep.subr.mxu0 %v4185_v28 }
  0xe3   :  { %v225_v30 = vpop.f32.mrf.mxu1 }
  0xe5   :  { %v227_v35 = vpop.f32.mrf.mxu1 }
  0xed   :  { %v146_v32 = vpop.f32.mrf.mxu0 }
  0xee   :  { %v226_v33 = vadd.f32 %v225_v30, %v146_v32  ;;  %v4191_v30 = vld [vmem:[%s5239_s4 + $0x8] sm:$0xff]  ;;  %v4200_v32 = vld [vmem:[%s5239_s4] sm:$0xff] }
  0xef   :  { %v148_v36 = vpop.f32.mrf.mxu0  ;;  %5279 = vst [vmem:[#allocation15_spill] sm:$0xff] %v4200_v32  ;;  %336 = vmatprep.subr.mxu1 %v4191_v30 }
  0xf0   :  { %v242_v37 = vadd.f32 %v235_v31, %v226_v33  ;;  %v228_v38 = vadd.f32 %v227_v35, %v148_v36  ;;  %v4194_v31 = vld [vmem:[#allocation2 + $0x30] sm:$0xff]  ;;  %v4203_v33 = vld [vmem:[#allocation2 + $0x28] sm:$0xff]  ;;  %337 = vmatpush1.msra.mxu1 %v4200_v32  ;;  %v4213_v35 = vld [vmem:[#allocation2 + $0x18] sm:$0xff] }
  0xf1   :  { %5278 = vst [vmem:[#allocation14_spill] sm:$0xff] %v4194_v31  ;;  %5280 = vst [vmem:[#allocation16_spill] sm:$0xff] %v4203_v33  ;;  %405 = vmatpush1.msra.mxu0 %v4194_v31  ;;  %535 = vmatprep.subr.mxu1 %v3978_v1  ;;  %v4217_v36 = vld [vmem:[#allocation2 + $0x10] sm:$0xff] }
  0xf2   :  { %v4074_v39 = vadd.f32 %v239_v34, %v228_v38  ;;  %v3619_v41 = vmul.f32 -1.442695, %v242_v37  ;;  %v4209_v34 = vld [vmem:[#allocation2 + $0x20] sm:$0xff]  ;;  %406 = vmatprep.subr.mxu0 %v4203_v33  ;;  %5282 = vst [vmem:[#allocation18_spill] sm:$0xff] %v4213_v35  ;;  %371 = vmatmul.mubr.f32.vlgmr.msra.gmra.mxu1 %v5243_v0  ;;  %5283 = vst [vmem:[#allocation19_spill] sm:$0xff] %v4217_v36  ;;  %v4221_v37 = vld [vmem:[#allocation2 + $0x8] sm:$0xff] }
  0xf3   :  { %5281 = vst [vmem:[#allocation17_spill] sm:$0xff] %v4209_v34  ;;  %536 = vmatpush1.msra.mxu1 %v3980_v2  ;;  %407 = vmatpush1.msra.mxu0 %v4209_v34  ;;  %5284 = vst [vmem:[#allocation20_spill] sm:$0xff] %v4221_v37 }
  0xf4   :  { %3687 = vtanh.f32 %v4074_v39  ;;  %537 = vmatprep.subr.mxu1 %v3982_v3  ;;  %408 = vmatprep.subr.mxu0 %v4213_v35 }
  0xf5   :  { %3689 = vpow2.f32 %v3619_v41  ;;  %538 = vmatpush1.msra.mxu1 %v3985_v4  ;;  %409 = vmatpush1.msra.mxu0 %v4217_v36 }
  0xf6   :  { %539 = vmatprep.subr.mxu1 %v3988_v5  ;;  %410 = vmatprep.subr.mxu0 %v4221_v37 }
  0xf7   :  { %540 = vmatpush1.msra.mxu1 %v3991_v6  ;;  %583 = vmatprep.mubr.f32.mxu1 %v5243_v0 }
  0xf8   :  { %541 = vmatprep.subr.mxu1 %v3999_v8 }
  0xf9   :  { %542 = vmatpush1.msra.mxu1 %v4008_v10 }
  0xfa   :  { %543 = vmatprep.subr.mxu1 %v4022_v13 }
  0xfb   :  { %544 = vmatpush1.msra.mxu1 %v4032_v16 }
  0xfc   :  { %545 = vmatprep.subr.mxu1 %v4036_v18 }
  0xfd   :  { %546 = vmatpush1.msra.mxu1 %v4039_v19 }
  0xfe   :  { %547 = vmatprep.subr.mxu1 %v4043_v21 }
  0xff   :  { %548 = vmatpush1.msra.mxu1 %v4047_v22 }
 0x100   :  { %549 = vmatprep.subr.mxu1 %v4051_v23 }
 0x101   :  { %v3688_v40 = vpop.eup %3687  ;;  %550 = vmatpush1.msra.mxu1 %v4054_v24  ;;  %v497_v24 = vld [vmem:[%s5235_s0 + $0x1] sm:$0x1] }
 0x102   :  { %259 = vrot.lane.b32.xlu0 %v3688_v40, %s3928_s25  ;;  %v3690_v42 = vpop.eup %3689  ;;  %836 = vmatprep.subr.mxu1 %v4127_v55 }
 0x103   :  { %v250_v43 = vadd.f32 1.0, %v3690_v42  ;;  %v4246_v42 = vld [vmem:[#allocation2] sm:$0xff] }
 0x104   :  { %5285 = vst [vmem:[#allocation21_spill] sm:$0xff] %v4246_v42  ;;  %411 = vmatpush1.msra.mxu0 %v4246_v42 }
 0x105   :  { %3691 = vrcp.f32 %v250_v43  ;;  %624 = vmatprep.subr.mxu0 %v3996_v7 }
 0x112   :  { %v4078_v44 = vpop.eup %3691 }
 0x113   :  { %v257_v38 = vmul.f32 0.0, %v4078_v44 }
 0x174   :  { %v260_v45 = vpop.permute.xlu0 %259 }
 0x175   :  { %v262_v46 = vmul.f32 %v4078_v44, %v260_v45  ;;  %v3620_v45 = vmul.f32 -1.442695, %v4074_v39  ;;  %v498_v44 = vld [vmem:[%s5235_s0 + $0x9] sm:$0x1] }
 0x176   :  { %v592_v26 = vrot.slane %v498_v44, 7 }
 0x177   :  { %264 = vrot.lane.b32.xlu0 %v262_v46, %s3928_s25 }
 0x178   :  { %v593_v39 = vsel %vm154_vm0, %v592_v26, %v497_v24  ;;  %v451_v26 = vld [vmem:[%s5241_s6] sm:$0x3] }
 0x1b2   :  { %v372_v24 = vpop.f32.mrf.mxu1 }
 0x1e9   :  { %v265_v40 = vpop.permute.xlu0 %264 }
 0x1ea   :  { %v4243_v41 = vadd.f32 %v265_v40, %v257_v38 }
 0x1ec   :  { %3693 = vtanh.f32 %v4243_v41 }
 0x1ed   :  { %3695 = vpow2.f32 %v3620_v45 }
 0x1f9   :  { %v3694_v43 = vpop.eup %3693 }
 0x1fa   :  { %270 = vrot.lane.b32.xlu1 %v3694_v43, %s3928_s25  ;;  %v3696_v46 = vpop.eup %3695  ;;  %v374_v43 = vpop.f32.mrf.mxu1 }
 0x1fb   :  { %v251_v0 = vadd.f32 1.0, %v3696_v46  ;;  %v667_v46 = vld [vmem:[%s5240_s5] sm:$0x3] }
 0x1fd   :  { %3697 = vrcp.f32 %v251_v0  ;;  %v5286_v0 = vmov 0.0  }
 0x20a   :  { %v3698_v38 = vpop.eup %3697 }
 0x26c   :  { %v271_v40 = vpop.permute.xlu1 %270 }
 0x26d   :  { %v273_v55 = vmul.f32 %v3698_v38, %v271_v40  ;;  %v460_v38 = vrot.slane %v451_v26, %v4070_v29 }
 0x26f   :  { %3621 = vmatmul.mubr.msk.f32.vlgmr.msra.gmra.mxu0 %vm76_vm2, %v273_v55  ;;  %3624 = vmatmul.mubr.msk.f32.vlgmr.msra.gmra.mxu1 %vm76_vm2, %v273_v55  ;;  %v456_v55 = vrot.slane %v451_v26, %v4064_v27 }
 0x270   :  { %625 = vmatpush1.msra.mxu0 %v4005_v9  ;;  %660 = vmatprep.mubr.f32.mxu0 %v5286_v0 }
 0x271   :  { %626 = vmatprep.subr.mxu0 %v4014_v11  ;;  %837 = vmatpush1.msra.mxu1 %v4129_v56 }
 0x272   :  { %627 = vmatpush1.msra.mxu0 %v4019_v12  ;;  %838 = vmatprep.subr.mxu1 %v4138_v58 }
 0x273   :  { %3625 = vmatmul.mubr.msk.f32.vlgmr.msra.gmra.mxu0 %vm156_vm1, %v593_v39  ;;  %762 = vmatprep.subr.mxu0 %v4085_v47 }
 0x274   :  { %763 = vmatpush1.msra.mxu0 %v4090_v48  ;;  %839 = vmatpush1.msra.mxu1 %v4140_v59 }
 0x275   :  { %764 = vmatprep.subr.mxu0 %v4095_v49  ;;  %840 = vmatprep.subr.mxu1 %v4149_v61 }
 0x276   :  { %765 = vmatpush1.msra.mxu0 %v4101_v50  ;;  %841 = vmatpush1.msra.mxu1 %v4158_v63 }
 0x277   :  { %766 = vmatprep.subr.mxu0 %v4107_v51  ;;  %842 = vmatprep.subr.mxu1 %v4167_v15 }
 0x278   :  { %767 = vmatpush1.msra.mxu0 %v4113_v52  ;;  %843 = vmatpush1.msra.mxu1 %v4176_v20 }
 0x279   :  { %768 = vmatprep.subr.mxu0 %v4119_v53  ;;  %844 = vmatprep.subr.mxu1 %v4185_v28 }
 0x27a   :  { %769 = vmatpush1.msra.mxu0 %v4125_v54  ;;  %845 = vmatpush1.msra.mxu1 %v4194_v31 }
 0x27b   :  { %770 = vmatprep.subr.mxu0 %v4135_v57  ;;  %846 = vmatprep.subr.mxu1 %v4203_v33  ;;  %v676_v33 = vrot.slane %v667_v46, %v4070_v29 }
 0x27c   :  { %771 = vmatpush1.msra.mxu0 %v4146_v60  ;;  %810 = vmatprep.mubr.f32.mxu0 %v5286_v0 }
 0x27d   :  { %772 = vmatprep.subr.mxu0 %v4155_v62  ;;  %847 = vmatpush1.msra.mxu1 %v4209_v34 }
 0x27e   :  { %773 = vmatpush1.msra.mxu0 %v4164_v14  ;;  %848 = vmatprep.subr.mxu1 %v4213_v35 }
 0x27f   :  { %774 = vmatprep.subr.mxu0 %v4173_v17  ;;  %849 = vmatpush1.msra.mxu1 %v4217_v36 }
 0x280   :  { %775 = vmatpush1.msra.mxu0 %v4182_v25  ;;  %850 = vmatprep.subr.mxu1 %v4221_v37  ;;  %v672_v37 = vrot.slane %v667_v46, %v4064_v27 }
 0x281   :  { %776 = vmatprep.subr.mxu0 %v4191_v30  ;;  %851 = vmatpush1.msra.mxu1 %v4246_v42 }
 0x282   :  { %777 = vmatpush1.msra.mxu0 %v4200_v32  ;;  %884 = vmatprep.mubr.f32.mxu1 %v5286_v0 }
 0x283   :  { %986 = vmatprep.subr.mxu0 %v3978_v1  ;;  %1075 = vmatprep.subr.mxu1 %v3996_v7 }
 0x32f   :  { %v446_v45 = vpop.f32.mrf.mxu0  ;;  %v585_v40 = vpop.f32.mrf.mxu1 }
 0x330   :  { %v447_v44 = vadd.f32 %v446_v45, %v372_v24 }
 0x331   :  { %v448_v39 = vpop.f32.mrf.mxu0  ;;  %v587_v31 = vpop.f32.mrf.mxu1 }
 0x332   :  { %v463_v42 = vadd.f32 %v456_v55, %v447_v44  ;;  %v449_v7 = vadd.f32 %v448_v39, %v374_v43 }
 0x333   :  { %v662_v36 = vpop.f32.mrf.mxu0 }
 0x334   :  { %v464_v35 = vadd.f32 %v460_v38, %v449_v7  ;;  %v663_v34 = vadd.f32 %v662_v36, %v585_v40  ;;  %v3622_v55 = vmul.f32 -1.442695, %v463_v42 }
 0x335   :  { %v664_v28 = vpop.f32.mrf.mxu0 }
 0x336   :  { %v679_v1 = vadd.f32 %v672_v37, %v663_v34  ;;  %v665_v20 = vadd.f32 %v664_v28, %v587_v31  ;;  %3699 = vtanh.f32 %v464_v35 }
 0x338   :  { %v680_v32 = vadd.f32 %v676_v33, %v665_v20  ;;  %v3626_v43 = vmul.f32 -1.442695, %v679_v1 }
 0x33a   :  { %3701 = vtanh.f32 %v680_v32 }
 0x33b   :  { %3703 = vpow2.f32 %v3622_v55  ;;  %v3623_v55 = vmul.f32 -1.442695, %v464_v35 }
 0x33c   :  { %3705 = vpow2.f32 %v3626_v43  ;;  %v3627_v43 = vmul.f32 -1.442695, %v680_v32 }
 0x343   :  { %v3700_v24 = vpop.eup %3699 }
 0x344   :  { %480 = vrot.lane.b32.xlu1 %v3700_v24, %s3928_s25 }
 0x347   :  { %v3702_v26 = vpop.eup %3701 }
 0x348   :  { %696 = vrot.lane.b32.xlu0 %v3702_v26, %s3928_s25  ;;  %v3704_v36 = vpop.eup %3703 }
 0x349   :  { %v471_v45 = vadd.f32 1.0, %v3704_v36  ;;  %v3706_v46 = vpop.eup %3705 }
 0x34a   :  { %v687_v44 = vadd.f32 1.0, %v3706_v46 }
 0x34b   :  { %3707 = vrcp.f32 %v471_v45 }
 0x34c   :  { %3709 = vrcp.f32 %v687_v44 }
 0x358   :  { %v3708_v28 = vpop.eup %3707 }
 0x359   :  { %v3710_v33 = vpop.eup %3709  ;;  %v478_v42 = vmul.f32 0.0, %v3708_v28 }
 0x35a   :  { %v694_v40 = vmul.f32 %v3710_v33, %v4243_v41 }
 0x3b6   :  { %v481_v31 = vpop.permute.xlu1 %480 }
 0x3b7   :  { %v483_v20 = vmul.f32 %v3708_v28, %v481_v31 }
 0x3b9   :  { %485 = vrot.lane.b32.xlu1 %v483_v20, %s3928_s25  ;;  %v949_v20 = vld [vmem:[%s5235_s0 + $0xa] sm:$0x1] }
 0x3ba   :  { %v697_v34 = vpop.permute.xlu0 %696 }
 0x3bb   :  { %v699_v37 = vmul.f32 %v3710_v33, %v697_v34  ;;  %v1043_v34 = vrot.slane %v949_v20, 7 }
 0x3bd   :  { %701 = vrot.lane.b32.xlu0 %v699_v37, %s3928_s25  ;;  %v948_v37 = vld [vmem:[%s5235_s0 + $0x2] sm:$0x1] }
 0x42b   :  { %v486_v38 = vpop.permute.xlu1 %485 }
 0x42c   :  { %v4315_v1 = vadd.f32 %v486_v38, %v478_v42  ;;  %v1044_v42 = vsel %vm154_vm0, %v1043_v34, %v948_v37 }
 0x42e   :  { %3711 = vtanh.f32 %v4315_v1 }
 0x42f   :  { %v702_v39 = vpop.permute.xlu0 %701 }
 0x430   :  { %v4319_v7 = vadd.f32 %v702_v39, %v694_v40 }
 0x432   :  { %3713 = vtanh.f32 %v4319_v7 }
 0x433   :  { %3715 = vpow2.f32 %v3623_v55 }
 0x434   :  { %3717 = vpow2.f32 %v3627_v43 }
 0x43b   :  { %v3712_v24 = vpop.eup %3711 }
 0x43c   :  { %491 = vrot.lane.b32.xlu1 %v3712_v24, %s3928_s25 }
 0x43f   :  { %v3714_v26 = vpop.eup %3713 }
 0x440   :  { %707 = vrot.lane.b32.xlu0 %v3714_v26, %s3928_s25  ;;  %v3716_v36 = vpop.eup %3715 }
 0x441   :  { %v472_v45 = vadd.f32 1.0, %v3716_v36  ;;  %v3718_v46 = vpop.eup %3717 }
 0x442   :  { %v688_v41 = vadd.f32 1.0, %v3718_v46 }
 0x443   :  { %3719 = vrcp.f32 %v472_v45 }
 0x444   :  { %3721 = vrcp.f32 %v688_v41 }
 0x450   :  { %v3720_v44 = vpop.eup %3719 }
 0x451   :  { %v3722_v32 = vpop.eup %3721 }
 0x4ae   :  { %v492_v28 = vpop.permute.xlu1 %491 }
 0x4af   :  { %v494_v31 = vmul.f32 %v3720_v44, %v492_v28 }
 0x4b1   :  { %496 = vst.msk [vmem:[%s5242_s7] sm:$0x3] %vm495_vm3, %v494_v31  ;;  %3628 = vmatmul.mubr.msk.f32.vlgmr.msra.gmra.mxu0 %vm76_vm2, %v494_v31 }
 0x4b2   :  { %987 = vmatpush1.msra.mxu0 %v3980_v2  ;;  %v708_v35 = vpop.permute.xlu0 %707  ;;  %1034 = vmatprep.mubr.f32.mxu0 %v5286_v0 }
 0x4b3   :  { %v710_v33 = vmul.f32 %v3722_v32, %v708_v35  ;;  %988 = vmatprep.subr.mxu0 %v3982_v3 }
 0x4b4   :  { %989 = vmatpush1.msra.mxu0 %v3985_v4 }
 0x4b5   :  { %990 = vmatprep.subr.mxu0 %v3988_v5  ;;  %3629 = vmatmul.mubr.msk.f32.vlgmr.msra.gmra.mxu1 %vm76_vm2, %v710_v33 }
 0x4b6   :  { %991 = vmatpush1.msra.mxu0 %v3991_v6  ;;  %1076 = vmatpush1.msra.mxu1 %v4005_v9  ;;  %v5287_v9 = vld [vmem:[#allocation9_spill] sm:$0xff] }
 0x4b7   :  { %992 = vmatprep.subr.mxu0 %v3999_v8  ;;  %1077 = vmatprep.subr.mxu1 %v4014_v11  ;;  %v5288_v11 = vld [vmem:[#allocation11_spill] sm:$0xff] }
 0x4b8   :  { %993 = vmatpush1.msra.mxu0 %v4008_v10  ;;  %1078 = vmatpush1.msra.mxu1 %v4019_v12  ;;  %v5289_v12 = vld [vmem:[#allocation15_spill] sm:$0xff] }
 0x4b9   :  { %994 = vmatprep.subr.mxu0 %v4022_v13  ;;  %1111 = vmatprep.mubr.f32.mxu1 %v5286_v0 }
 0x4ba   :  { %995 = vmatpush1.msra.mxu0 %v4032_v16  ;;  %3633 = vmatmul.mubr.msk.f32.vlgmr.msra.gmra.mxu1 %vm156_vm1, %v1044_v42  ;;  %v5290_v16 = vld [vmem:[#allocation12_spill] sm:$0xff] }
 0x4bb   :  { %996 = vmatprep.subr.mxu0 %v4036_v18  ;;  %1212 = vmatprep.subr.mxu1 %v4085_v47  ;;  %v5291_v18 = vld [vmem:[#allocation8_spill] sm:$0xff]  ;;  %v5296_v47 = vld [vmem:[#allocation18_spill] sm:$0xff] }
 0x4bc   :  { %997 = vmatpush1.msra.mxu0 %v4039_v19  ;;  %1213 = vmatpush1.msra.mxu1 %v4090_v48  ;;  %v5292_v19 = vld [vmem:[#allocation13_spill] sm:$0xff]  ;;  %v5297_v48 = vld [vmem:[#allocation19_spill] sm:$0xff] }
 0x4bd   :  { %998 = vmatprep.subr.mxu0 %v4043_v21  ;;  %1214 = vmatprep.subr.mxu1 %v4095_v49  ;;  %v5293_v21 = vld [vmem:[#allocation14_spill] sm:$0xff]  ;;  %v5298_v49 = vld [vmem:[#allocation20_spill] sm:$0xff] }
 0x4be   :  { %999 = vmatpush1.msra.mxu0 %v4047_v22  ;;  %1215 = vmatpush1.msra.mxu1 %v4101_v50  ;;  %v5294_v22 = vld [vmem:[#allocation16_spill] sm:$0xff]  ;;  %v5299_v50 = vld [vmem:[#allocation21_spill] sm:$0xff] }
 0x4bf   :  { %1000 = vmatprep.subr.mxu0 %v4051_v23  ;;  %1216 = vmatprep.subr.mxu1 %v4107_v51  ;;  %v5295_v23 = vld [vmem:[#allocation17_spill] sm:$0xff]  ;;  %v891_v51 = vld [vmem:[%s5241_s6] sm:$0x3] }
 0x4c0   :  { %1001 = vmatpush1.msra.mxu0 %v5287_v9  ;;  %1217 = vmatpush1.msra.mxu1 %v4113_v52 }
 0x4c1   :  { %3632 = vmatmul.mubr.msk.f32.vlgmr.msra.gmra.mxu0 %vm76_vm2, %v710_v33  ;;  %1218 = vmatprep.subr.mxu1 %v4119_v53  ;;  %v896_v53 = vrot.slane %v891_v51, %v4064_v27 }
 0x4c2   :  { %1219 = vmatpush1.msra.mxu1 %v4125_v54  ;;  %1286 = vmatprep.subr.mxu0 %v5288_v11 }
 0x4c3   :  { %1220 = vmatprep.subr.mxu1 %v4135_v57  ;;  %1287 = vmatpush1.msra.mxu0 %v4129_v56  ;;  %v900_v57 = vrot.slane %v891_v51, %v4070_v29 }
 0x4c4   :  { %1221 = vmatpush1.msra.mxu1 %v4146_v60  ;;  %1288 = vmatprep.subr.mxu0 %v4138_v58 }
 0x4c5   :  { %1222 = vmatprep.subr.mxu1 %v4155_v62  ;;  %1289 = vmatpush1.msra.mxu0 %v4140_v59 }
 0x4c6   :  { %1223 = vmatpush1.msra.mxu1 %v4164_v14  ;;  %1290 = vmatprep.subr.mxu0 %v4149_v61 }
 0x4c7   :  { %1224 = vmatprep.subr.mxu1 %v4173_v17  ;;  %1260 = vmatprep.mubr.f32.mxu1 %v5286_v0 }
 0x4c8   :  { %1225 = vmatpush1.msra.mxu1 %v4182_v25  ;;  %1291 = vmatpush1.msra.mxu0 %v4158_v63  ;;  %v1118_v63 = vld [vmem:[%s5240_s5] sm:$0x3] }
 0x4c9   :  { %1226 = vmatprep.subr.mxu1 %v4191_v30  ;;  %1292 = vmatprep.subr.mxu0 %v4167_v15  ;;  %v1123_v15 = vrot.slane %v1118_v63, %v4064_v27  ;;  %v1127_v30 = vrot.slane %v1118_v63, %v4070_v29 }
 0x4ca   :  { %1227 = vmatpush1.msra.mxu1 %v5289_v12  ;;  %1293 = vmatpush1.msra.mxu0 %v5290_v16 }
 0x4cb   :  { %1424 = vmatprep.subr.mxu1 %v5291_v18  ;;  %1294 = vmatprep.subr.mxu0 %v5292_v19 }
 0x4cc   :  { %1295 = vmatpush1.msra.mxu0 %v5293_v21  ;;  %1334 = vmatprep.mubr.f32.mxu0 %v5286_v0  ;;  %v4420_v21 = vld [vmem:[%s5236_s1 + $0x18] sm:$0xff] }
 0x4cd   :  { %1296 = vmatprep.subr.mxu0 %v5294_v22 }
 0x4ce   :  { %1297 = vmatpush1.msra.mxu0 %v5295_v23 }
 0x4cf   :  { %1298 = vmatprep.subr.mxu0 %v5296_v47 }
 0x4d0   :  { %1299 = vmatpush1.msra.mxu0 %v5297_v48 }
 0x4d1   :  { %1300 = vmatprep.subr.mxu0 %v5298_v49 }
 0x4d2   :  { %1301 = vmatpush1.msra.mxu0 %v5299_v50 }
 0x4d3   :  { %1513 = vmatprep.subr.mxu0 %v4420_v21 }
 0x571   :  { %v812_v52 = vpop.f32.mrf.mxu0 }
 0x573   :  { %v814_v58 = vpop.f32.mrf.mxu0 }
 0x575   :  { %v886_v54 = vpop.f32.mrf.mxu1 }
 0x576   :  { %v887_v56 = vadd.f32 %v886_v54, %v812_v52  ;;  %v4438_v54 = vld [vmem:[#allocation4 + $0x28] sm:$0xff] }
 0x577   :  { %v888_v59 = vpop.f32.mrf.mxu1 }
 0x578   :  { %v903_v60 = vadd.f32 %v896_v53, %v887_v56  ;;  %v889_v61 = vadd.f32 %v888_v59, %v814_v58  ;;  %v4435_v53 = vld [vmem:[#allocation4 + $0x30] sm:$0xff]  ;;  %v4463_v58 = vld [vmem:[#allocation4 + $0x8] sm:$0xff]  ;;  %v1386_v59 = vld [vmem:[%s5235_s0 + $0x3] sm:$0x1] }
 0x579   :  { %v4455_v56 = vld [vmem:[#allocation4 + $0x10] sm:$0xff] }
 0x57a   :  { %v904_v62 = vadd.f32 %v900_v57, %v889_v61  ;;  %v1113_v14 = vpop.f32.mrf.mxu1  ;;  %v3630_v36 = vmul.f32 -1.442695, %v903_v60  ;;  %v4473_v60 = vld [vmem:[%s5236_s1] sm:$0xff] }
 0x57c   :  { %3723 = vtanh.f32 %v904_v62  ;;  %v1115_v38 = vpop.f32.mrf.mxu1  ;;  %v3631_v22 = vmul.f32 -1.442695, %v904_v62  ;;  %v1341_v62 = vld [vmem:[%s5241_s6] sm:$0x3] }
 0x581   :  { %v1036_v17 = vpop.f32.mrf.mxu0 }
 0x582   :  { %v1114_v25 = vadd.f32 %v1113_v14, %v1036_v17  ;;  %v1346_v14 = vrot.slane %v1341_v62, %v4064_v27 }
 0x583   :  { %v1038_v40 = vpop.f32.mrf.mxu0 }
 0x584   :  { %v1130_v39 = vadd.f32 %v1123_v15, %v1114_v25  ;;  %v1116_v24 = vadd.f32 %v1115_v38, %v1038_v40  ;;  %v1556_v25 = vld [vmem:[%s5240_s5] sm:$0x3] }
 0x586   :  { %v1131_v26 = vadd.f32 %v1127_v30, %v1116_v24  ;;  %v3634_v45 = vmul.f32 -1.442695, %v1130_v39 }
 0x588   :  { %3725 = vtanh.f32 %v1131_v26 }
 0x589   :  { %v3724_v55 = vpop.eup %3723  ;;  %3727 = vpow2.f32 %v3630_v36 }
 0x58a   :  { %920 = vrot.lane.b32.xlu1 %v3724_v55, %s3928_s25  ;;  %3729 = vpow2.f32 %v3634_v45 }
 0x595   :  { %v3726_v43 = vpop.eup %3725 }
 0x596   :  { %1147 = vrot.lane.b32.xlu0 %v3726_v43, %s3928_s25  ;;  %v3728_v46 = vpop.eup %3727 }
 0x597   :  { %v911_v41 = vadd.f32 1.0, %v3728_v46  ;;  %v3730_v44 = vpop.eup %3729  ;;  %v1565_v46 = vrot.slane %v1556_v25, %v4070_v29 }
 0x598   :  { %v1138_v28 = vadd.f32 1.0, %v3730_v44 }
 0x599   :  { %3731 = vrcp.f32 %v911_v41 }
 0x59a   :  { %3733 = vrcp.f32 %v1138_v28 }
 0x5a6   :  { %v3732_v31 = vpop.eup %3731 }
 0x5a7   :  { %v3734_v35 = vpop.eup %3733  ;;  %v918_v37 = vmul.f32 %v3732_v31, %v4315_v1 }
 0x5a8   :  { %v1145_v12 = vmul.f32 %v3734_v35, %v4319_v7  ;;  %v3635_v7 = vmul.f32 -1.442695, %v1131_v26  ;;  %v1561_v26 = vrot.slane %v1556_v25, %v4064_v27  ;;  %v4589_v25 = vld [vmem:[%s5239_s4 + $0x28] sm:$0xff] }
 0x5fc   :  { %v921_v20 = vpop.permute.xlu1 %920 }
 0x5fd   :  { %v923_v32 = vmul.f32 %v3732_v31, %v921_v20 }
 0x5ff   :  { %925 = vrot.lane.b32.xlu1 %v923_v32, %s3928_s25 }
 0x608   :  { %v1148_v33 = vpop.permute.xlu0 %1147 }
 0x609   :  { %v1150_v34 = vmul.f32 %v3734_v35, %v1148_v33 }
 0x60b   :  { %1152 = vrot.lane.b32.xlu0 %v1150_v34, %s3928_s25 }
 0x671   :  { %v926_v42 = vpop.permute.xlu1 %925 }
 0x672   :  { %v4409_v11 = vadd.f32 %v926_v42, %v918_v37 }
 0x674   :  { %3735 = vtanh.f32 %v4409_v11 }
 0x67d   :  { %v1153_v16 = vpop.permute.xlu0 %1152 }
 0x67e   :  { %v4413_v18 = vadd.f32 %v1153_v16, %v1145_v12 }
 0x680   :  { %3737 = vtanh.f32 %v4413_v18 }
 0x681   :  { %v3736_v19 = vpop.eup %3735  ;;  %3739 = vpow2.f32 %v3631_v22 }
 0x682   :  { %931 = vrot.lane.b32.xlu1 %v3736_v19, %s3928_s25  ;;  %3741 = vpow2.f32 %v3635_v7 }
 0x68d   :  { %v3738_v1 = vpop.eup %3737 }
 0x68e   :  { %1158 = vrot.lane.b32.xlu0 %v3738_v1, %s3928_s25  ;;  %v3740_v23 = vpop.eup %3739 }
 0x68f   :  { %v912_v47 = vadd.f32 1.0, %v3740_v23  ;;  %v3742_v48 = vpop.eup %3741 }
 0x690   :  { %v1139_v49 = vadd.f32 1.0, %v3742_v48  ;;  %v4515_v48 = vld [vmem:[%s5239_s4 + $0x70] sm:$0xff] }
 0x691   :  { %3743 = vrcp.f32 %v912_v47  ;;  %v4510_v47 = vld [vmem:[%s5239_s4 + $0x78] sm:$0xff] }
 0x692   :  { %3745 = vrcp.f32 %v1139_v49  ;;  %v4520_v49 = vld [vmem:[%s5239_s4 + $0x68] sm:$0xff] }
 0x69e   :  { %v3744_v50 = vpop.eup %3743 }
 0x6f4   :  { %v932_v51 = vpop.permute.xlu1 %931 }
 0x6f5   :  { %v4424_v52 = vmul.f32 %v3744_v50, %v932_v51  ;;  %v4526_v50 = vld [vmem:[%s5239_s4 + $0x60] sm:$0xff]  ;;  %v4532_v51 = vld [vmem:[%s5239_s4 + $0x58] sm:$0xff] }
 0x6f7   :  { %5300 = vst [vmem:[#allocation9_spill] sm:$0xff] %v4424_v52  ;;  %3636 = vmatmul.mubr.msk.f32.vlgmr.msra.gmra.mxu1 %vm76_vm2, %v4424_v52 }
 0x6f8   :  { %1425 = vmatpush1.msra.mxu1 %v3980_v2  ;;  %1472 = vmatprep.mubr.f32.mxu1 %v5286_v0  ;;  %v1387_v2 = vld [vmem:[%s5235_s0 + $0xb] sm:$0x1] }
 0x6f9   :  { %1426 = vmatprep.subr.mxu1 %v3982_v3  ;;  %v4444_v3 = vld [vmem:[#allocation4 + $0x20] sm:$0xff]  ;;  %v1481_v57 = vrot.slane %v1387_v2, 7  ;;  %v4534_v2 = vld [vmem:[#allocation2 + $0x78] sm:$0xff] }
 0x6fa   :  { %1427 = vmatpush1.msra.mxu1 %v3985_v4  ;;  %v3746_v4 = vpop.eup %3745 }
 0x6fb   :  { %1428 = vmatprep.subr.mxu1 %v3988_v5  ;;  %v1482_v61 = vsel %vm154_vm0, %v1481_v57, %v1386_v59  ;;  %v4551_v57 = vld [vmem:[%s5239_s4 + $0x48] sm:$0xff]  ;;  %v4554_v59 = vld [vmem:[#allocation2 + $0x60] sm:$0xff] }
 0x6fc   :  { %1429 = vmatpush1.msra.mxu1 %v3991_v6  ;;  %v4447_v6 = vld [vmem:[#allocation4 + $0x18] sm:$0xff] }
 0x6fd   :  { %1430 = vmatprep.subr.mxu1 %v3999_v8 }
 0x6fe   :  { %1431 = vmatpush1.msra.mxu1 %v4008_v10  ;;  %v4453_v10 = vld [vmem:[%s5236_s1 + $0x10] sm:$0xff] }
 0x6ff   :  { %1432 = vmatprep.subr.mxu1 %v4022_v13  ;;  %v4461_v13 = vld [vmem:[%s5236_s1 + $0x8] sm:$0xff] }
 0x700   :  { %v1159_v5 = vpop.permute.xlu0 %1158  ;;  %1433 = vmatpush1.msra.mxu1 %v4435_v53 }
 0x701   :  { %v1161_v8 = vmul.f32 %v3746_v4, %v1159_v5  ;;  %1434 = vmatprep.subr.mxu1 %v4438_v54  ;;  %v4536_v4 = vld [vmem:[#allocation2 + $0x70] sm:$0xff] }
 0x702   :  { %1435 = vmatpush1.msra.mxu1 %v4444_v3  ;;  %v4542_v5 = vld [vmem:[%s5239_s4 + $0x50] sm:$0xff] }
 0x703   :  { %3637 = vmatmul.mubr.msk.f32.vlgmr.msra.gmra.mxu0 %vm76_vm2, %v1161_v8  ;;  %1436 = vmatprep.subr.mxu1 %v4447_v6 }
 0x704   :  { %1514 = vmatpush1.msra.mxu0 %v4453_v10  ;;  %1437 = vmatpush1.msra.mxu1 %v4455_v56 }
 0x705   :  { %1515 = vmatprep.subr.mxu0 %v4461_v13  ;;  %1438 = vmatprep.subr.mxu1 %v4463_v58 }
 0x706   :  { %1516 = vmatpush1.msra.mxu0 %v4473_v60  ;;  %1439 = vmatpush1.msra.mxu1 %v5287_v9  ;;  %v1350_v9 = vrot.slane %v1341_v62, %v4070_v29  ;;  %v4562_v62 = vld [vmem:[%s5239_s4 + $0x40] sm:$0xff] }
 0x707   :  { %1549 = vmatprep.mubr.f32.mxu0 %v5286_v0  ;;  %3640 = vmatmul.mubr.msk.f32.vlgmr.msra.gmra.mxu1 %vm76_vm2, %v1161_v8  ;;  %v4545_v8 = vld [vmem:[#allocation2 + $0x68] sm:$0xff] }
 0x708   :  { %3641 = vmatmul.mubr.msk.f32.vlgmr.msra.gmra.mxu0 %vm156_vm1, %v1482_v61  ;;  %1773 = vmatprep.mubr.f32.mxu1 %v5286_v0  ;;  %v4556_v61 = vld [vmem:[#allocation2 + $0x58] sm:$0xff] }
 0x709   :  { %1699 = vmatprep.mubr.f32.mxu0 %v5286_v0  ;;  %1651 = vmatprep.subr.mxu0 %v4510_v47 }
 0x70a   :  { %1652 = vmatpush1.msra.mxu0 %v4515_v48  ;;  %1725 = vmatprep.subr.mxu1 %v4534_v2 }
 0x70b   :  { %1653 = vmatprep.subr.mxu0 %v4520_v49  ;;  %1726 = vmatpush1.msra.mxu1 %v4536_v4 }
 0x70c   :  { %1654 = vmatpush1.msra.mxu0 %v4526_v50  ;;  %1727 = vmatprep.subr.mxu1 %v4545_v8 }
 0x70d   :  { %1655 = vmatprep.subr.mxu0 %v4532_v51  ;;  %1728 = vmatpush1.msra.mxu1 %v4554_v59 }
 0x70e   :  { %1656 = vmatpush1.msra.mxu0 %v4542_v5  ;;  %1729 = vmatprep.subr.mxu1 %v4556_v61 }
 0x70f   :  { %1657 = vmatprep.subr.mxu0 %v4551_v57 }
 0x710   :  { %1658 = vmatpush1.msra.mxu0 %v4562_v62 }
 0x7b7   :  { %v1262_v63 = vpop.f32.mrf.mxu1 }
 0x7b9   :  { %v1264_v30 = vpop.f32.mrf.mxu1 }
 0x7c3   :  { %v1336_v15 = vpop.f32.mrf.mxu0 }
 0x7c4   :  { %v1337_v17 = vadd.f32 %v1336_v15, %v1262_v63  ;;  %v4565_v63 = vld [vmem:[#allocation2 + $0x50] sm:$0xff]  ;;  %v4574_v15 = vld [vmem:[#allocation2 + $0x48] sm:$0xff] }
 0x7c5   :  { %v1338_v38 = vpop.f32.mrf.mxu0  ;;  %1730 = vmatpush1.msra.mxu1 %v4565_v63 }
 0x7c6   :  { %v1353_v40 = vadd.f32 %v1346_v14, %v1337_v17  ;;  %v1339_v39 = vadd.f32 %v1338_v38, %v1264_v30  ;;  %v4571_v14 = vld [vmem:[%s5239_s4 + $0x38] sm:$0xff]  ;;  %v4580_v17 = vld [vmem:[%s5239_s4 + $0x30] sm:$0xff]  ;;  %v4598_v38 = vld [vmem:[%s5239_s4 + $0x20] sm:$0xff]  ;;  %1731 = vmatprep.subr.mxu1 %v4574_v15 }
 0x7c7   :  { %v1474_v24 = vpop.f32.mrf.mxu1  ;;  %v4592_v30 = vld [vmem:[#allocation2 + $0x38] sm:$0xff]  ;;  %1659 = vmatprep.subr.mxu0 %v4571_v14  ;;  %5301 = vst [vmem:[#allocation11_spill] sm:$0xff] %v4598_v38 }
 0x7c8   :  { %v4496_v55 = vadd.f32 %v1350_v9, %v1339_v39  ;;  %v1551_v43 = vpop.f32.mrf.mxu0  ;;  %v3638_v35 = vmul.f32 -1.442695, %v1353_v40  ;;  %v4583_v9 = vld [vmem:[#allocation2 + $0x40] sm:$0xff]  ;;  %v4601_v40 = vld [vmem:[#allocation2 + $0x30] sm:$0xff]  ;;  %1660 = vmatpush1.msra.mxu0 %v4580_v17  ;;  %v4607_v39 = vld [vmem:[%s5239_s4 + $0x18] sm:$0xff] }
 0x7c9   :  { %v1552_v36 = vadd.f32 %v1551_v43, %v1474_v24  ;;  %v1476_v45 = vpop.f32.mrf.mxu1  ;;  %5302 = vst [vmem:[#allocation15_spill] sm:$0xff] %v4607_v39  ;;  %1732 = vmatpush1.msra.mxu1 %v4583_v9  ;;  %1661 = vmatprep.subr.mxu0 %v4589_v25  ;;  %v4614_v24 = vld [vmem:[%s5239_s4 + $0x10] sm:$0xff] }
 0x7ca   :  { %v1553_v41 = vpop.f32.mrf.mxu0  ;;  %3747 = vtanh.f32 %v4496_v55  ;;  %5303 = vst [vmem:[#allocation12_spill] sm:$0xff] %v4614_v24  ;;  %1733 = vmatprep.subr.mxu1 %v4592_v30  ;;  %1662 = vmatpush1.msra.mxu0 %v4598_v38 }
 0x7cb   :  { %v1568_v44 = vadd.f32 %v1561_v26, %v1552_v36  ;;  %v1554_v28 = vadd.f32 %v1553_v41, %v1476_v45  ;;  %v4621_v26 = vld [vmem:[%s5239_s4 + $0x8] sm:$0xff]  ;;  %1734 = vmatpush1.msra.mxu1 %v4601_v40  ;;  %1663 = vmatprep.subr.mxu0 %v4607_v39  ;;  %v4635_v41 = vld [vmem:[%s5239_s4] sm:$0xff] }
 0x7cc   :  { %5304 = vst [vmem:[#allocation8_spill] sm:$0xff] %v4621_v26  ;;  %1664 = vmatpush1.msra.mxu0 %v4614_v24  ;;  %5305 = vst [vmem:[#allocation13_spill] sm:$0xff] %v4635_v41 }
 0x7cd   :  { %v4500_v31 = vadd.f32 %v1565_v46, %v1554_v28  ;;  %v3642_v33 = vmul.f32 -1.442695, %v1568_v44  ;;  %1665 = vmatprep.subr.mxu0 %v4621_v26  ;;  %v4637_v44 = vld [vmem:[#allocation2 + $0x28] sm:$0xff] }
 0x7ce   :  { %1666 = vmatpush1.msra.mxu0 %v4635_v41  ;;  %1735 = vmatprep.subr.mxu1 %v4637_v44 }
 0x7cf   :  { %3749 = vtanh.f32 %v4500_v31 }
 0x7d0   :  { %3751 = vpow2.f32 %v3638_v35  ;;  %v4652_v35 = vld [vmem:[#allocation2 + $0x10] sm:$0xff] }
 0x7d1   :  { %3753 = vpow2.f32 %v3642_v33  ;;  %5309 = vst [vmem:[#allocation18_spill] sm:$0xff] %v4652_v35  ;;  %v4656_v33 = vld [vmem:[#allocation2 + $0x8] sm:$0xff] }
 0x7d2   :  { %5310 = vst [vmem:[#allocation19_spill] sm:$0xff] %v4656_v33 }
 0x7d7   :  { %v3748_v20 = vpop.eup %3747 }
 0x7d8   :  { %1370 = vrot.lane.b32.xlu1 %v3748_v20, %s3928_s25  ;;  %v4643_v20 = vld [vmem:[#allocation4 + $0x78] sm:$0xff] }
 0x7d9   :  { %5307 = vst [vmem:[#allocation16_spill] sm:$0xff] %v4643_v20  ;;  %1874 = vmatprep.subr.mxu0 %v4643_v20 }
 0x7dc   :  { %v3750_v32 = vpop.eup %3749 }
 0x7dd   :  { %1585 = vrot.lane.b32.xlu0 %v3750_v32, %s3928_s25  ;;  %v3752_v34 = vpop.eup %3751 }
 0x7de   :  { %v1361_v37 = vadd.f32 1.0, %v3752_v34  ;;  %v3754_v42 = vpop.eup %3753  ;;  %v4659_v34 = vld [vmem:[#allocation2] sm:$0xff] }
 0x7df   :  { %v1576_v12 = vadd.f32 1.0, %v3754_v42  ;;  %5311 = vst [vmem:[#allocation20_spill] sm:$0xff] %v4659_v34 }
 0x7e0   :  { %3755 = vrcp.f32 %v1361_v37 }
 0x7e1   :  { %3757 = vrcp.f32 %v1576_v12  ;;  %v3639_v12 = vmul.f32 -1.442695, %v4496_v55  ;;  %v4676_v55 = vld [vmem:[#allocation4 + $0x60] sm:$0xff] }
 0x7ed   :  { %v3756_v16 = vpop.eup %3755 }
 0x7ee   :  { %v3758_v22 = vpop.eup %3757  ;;  %v1368_v43 = vmul.f32 %v3756_v16, %v4409_v11  ;;  %v4641_v11 = vld [vmem:[#allocation2 + $0x20] sm:$0xff] }
 0x7ef   :  { %v1583_v46 = vmul.f32 %v3758_v22, %v4413_v18  ;;  %5306 = vst [vmem:[#allocation14_spill] sm:$0xff] %v4641_v11  ;;  %1736 = vmatpush1.msra.mxu1 %v4641_v11  ;;  %v4649_v18 = vld [vmem:[#allocation2 + $0x18] sm:$0xff] }
 0x7f0   :  { %5308 = vst [vmem:[#allocation17_spill] sm:$0xff] %v4649_v18  ;;  %1737 = vmatprep.subr.mxu1 %v4649_v18 }
 0x7f1   :  { %1738 = vmatpush1.msra.mxu1 %v4652_v35 }
 0x7f2   :  { %1739 = vmatprep.subr.mxu1 %v4656_v33 }
 0x7f3   :  { %1740 = vmatpush1.msra.mxu1 %v4659_v34 }
 0x7f4   :  { %1963 = vmatprep.subr.mxu1 %v4420_v21 }
 0x84a   :  { %v1371_v19 = vpop.permute.xlu1 %1370 }
 0x84b   :  { %v1373_v1 = vmul.f32 %v3756_v16, %v1371_v19  ;;  %v3643_v16 = vmul.f32 -1.442695, %v4500_v31  ;;  %v1837_v31 = vld [vmem:[%s5235_s0 + $0xc] sm:$0x1] }
 0x84d   :  { %1375 = vrot.lane.b32.xlu1 %v1373_v1, %s3928_s25 }
 0x84f   :  { %v1586_v7 = vpop.permute.xlu0 %1585 }
 0x850   :  { %v1588_v23 = vmul.f32 %v3758_v22, %v1586_v7 }
 0x852   :  { %1590 = vrot.lane.b32.xlu0 %v1588_v23, %s3928_s25 }
 0x8bf   :  { %v1376_v36 = vpop.permute.xlu1 %1375 }
 0x8c0   :  { %v4628_v45 = vadd.f32 %v1376_v36, %v1368_v43 }
 0x8c2   :  { %3759 = vtanh.f32 %v4628_v45 }
 0x8c4   :  { %v1591_v28 = vpop.permute.xlu0 %1590 }
 0x8c5   :  { %v4645_v32 = vadd.f32 %v1591_v28, %v1583_v46  ;;  %v4667_v46 = vld [vmem:[#allocation4 + $0x70] sm:$0xff]  ;;  %v4669_v28 = vld [vmem:[#allocation4 + $0x68] sm:$0xff] }
 0x8c7   :  { %3761 = vtanh.f32 %v4645_v32 }
 0x8c8   :  { %3763 = vpow2.f32 %v3639_v12 }
 0x8c9   :  { %3765 = vpow2.f32 %v3643_v16  ;;  %v4686_v16 = vld [vmem:[#allocation4 + $0x50] sm:$0xff] }
 0x8cf   :  { %v3760_v37 = vpop.eup %3759 }
 0x8d0   :  { %1381 = vrot.lane.b32.xlu1 %v3760_v37, %s3928_s25  ;;  %v4682_v37 = vld [vmem:[#allocation4 + $0x58] sm:$0xff] }
 0x8d4   :  { %v3762_v42 = vpop.eup %3761 }
 0x8d5   :  { %1596 = vrot.lane.b32.xlu0 %v3762_v42, %s3928_s25  ;;  %v3764_v19 = vpop.eup %3763 }
 0x8d6   :  { %v1362_v1 = vadd.f32 1.0, %v3764_v19  ;;  %v3766_v22 = vpop.eup %3765 }
 0x8d7   :  { %v1577_v7 = vadd.f32 1.0, %v3766_v22  ;;  %v1931_v22 = vrot.slane %v1837_v31, 7  ;;  %v4715_v31 = vld [vmem:[#allocation4] sm:$0xff] }
 0x8d8   :  { %3767 = vrcp.f32 %v1362_v1  ;;  %v4689_v1 = vld [vmem:[#allocation4 + $0x48] sm:$0xff] }
 0x8d9   :  { %3769 = vrcp.f32 %v1577_v7  ;;  %v4692_v7 = vld [vmem:[#allocation4 + $0x40] sm:$0xff] }
 0x8e5   :  { %v3768_v23 = vpop.eup %3767 }
 0x8e6   :  { %v3770_v42 = vpop.eup %3769 }
 0x942   :  { %v1382_v43 = vpop.permute.xlu1 %1381 }
 0x943   :  { %v1384_v36 = vmul.f32 %v3768_v23, %v1382_v43  ;;  %v1836_v23 = vld [vmem:[%s5235_s0 + $0x4] sm:$0x1]  ;;  %v4699_v43 = vld [vmem:[#allocation4 + $0x38] sm:$0xff] }
 0x945   :  { %1385 = vst.msk [vmem:[%s5242_s7 + $0x2] sm:$0x3] %vm495_vm3, %v1384_v36  ;;  %3644 = vmatmul.mubr.msk.f32.vlgmr.msra.gmra.mxu0 %vm76_vm2, %v1384_v36  ;;  %v1932_v36 = vsel %vm154_vm0, %v1931_v22, %v1836_v23 }
 0x946   :  { %1875 = vmatpush1.msra.mxu0 %v4667_v46  ;;  %1922 = vmatprep.mubr.f32.mxu0 %v5286_v0 }
 0x947   :  { %v1597_v12 = vpop.permute.xlu0 %1596  ;;  %1876 = vmatprep.subr.mxu0 %v4669_v28 }
 0x948   :  { %v1599_v19 = vmul.f32 %v3770_v42, %v1597_v12  ;;  %1877 = vmatpush1.msra.mxu0 %v4676_v55  ;;  %v1780_v42 = vld [vmem:[%s5241_s6] sm:$0x3] }
 0x949   :  { %1878 = vmatprep.subr.mxu0 %v4682_v37 }
 0x94a   :  { %3645 = vmatmul.mubr.msk.f32.vlgmr.msra.gmra.mxu1 %vm76_vm2, %v1599_v19  ;;  %1879 = vmatpush1.msra.mxu0 %v4686_v16 }
 0x94b   :  { %1880 = vmatprep.subr.mxu0 %v4689_v1  ;;  %1964 = vmatpush1.msra.mxu1 %v4453_v10 }
 0x94c   :  { %1881 = vmatpush1.msra.mxu0 %v4692_v7  ;;  %1965 = vmatprep.subr.mxu1 %v4461_v13 }
 0x94d   :  { %1882 = vmatprep.subr.mxu0 %v4699_v43  ;;  %1966 = vmatpush1.msra.mxu1 %v4473_v60 }
 0x94e   :  { %1883 = vmatpush1.msra.mxu0 %v4435_v53  ;;  %1999 = vmatprep.mubr.f32.mxu1 %v5286_v0 }
 0x94f   :  { %1884 = vmatprep.subr.mxu0 %v4438_v54  ;;  %3649 = vmatmul.mubr.msk.f32.vlgmr.msra.gmra.mxu1 %vm156_vm1, %v1932_v36  ;;  %v1789_v36 = vrot.slane %v1780_v42, %v4070_v29 }
 0x950   :  { %1885 = vmatpush1.msra.mxu0 %v4444_v3  ;;  %2100 = vmatprep.subr.mxu1 %v4510_v47 }
 0x951   :  { %1886 = vmatprep.subr.mxu0 %v4447_v6  ;;  %2101 = vmatpush1.msra.mxu1 %v4515_v48 }
 0x952   :  { %1887 = vmatpush1.msra.mxu0 %v4455_v56  ;;  %2102 = vmatprep.subr.mxu1 %v4520_v49 }
 0x953   :  { %1888 = vmatprep.subr.mxu0 %v4463_v58  ;;  %2103 = vmatpush1.msra.mxu1 %v4526_v50 }
 0x954   :  { %1889 = vmatpush1.msra.mxu0 %v4715_v31  ;;  %2104 = vmatprep.subr.mxu1 %v4532_v51 }
 0x955   :  { %3648 = vmatmul.mubr.msk.f32.vlgmr.msra.gmra.mxu0 %vm76_vm2, %v1599_v19  ;;  %2105 = vmatpush1.msra.mxu1 %v4542_v5  ;;  %v1785_v19 = vrot.slane %v1780_v42, %v4064_v27 }
 0x956   :  { %2106 = vmatprep.subr.mxu1 %v4551_v57  ;;  %2174 = vmatprep.subr.mxu0 %v4534_v2 }
 0x957   :  { %2107 = vmatpush1.msra.mxu1 %v4562_v62  ;;  %2175 = vmatpush1.msra.mxu0 %v4536_v4 }
 0x958   :  { %2108 = vmatprep.subr.mxu1 %v4571_v14  ;;  %2176 = vmatprep.subr.mxu0 %v4545_v8 }
 0x959   :  { %2109 = vmatpush1.msra.mxu1 %v4580_v17  ;;  %2177 = vmatpush1.msra.mxu0 %v4554_v59 }
 0x95a   :  { %2110 = vmatprep.subr.mxu1 %v4589_v25  ;;  %2178 = vmatprep.subr.mxu0 %v4556_v61 }
 0x95b   :  { %2111 = vmatpush1.msra.mxu1 %v4598_v38  ;;  %2148 = vmatprep.mubr.f32.mxu1 %v5286_v0 }
 0x95c   :  { %2112 = vmatprep.subr.mxu1 %v4607_v39  ;;  %2179 = vmatpush1.msra.mxu0 %v4565_v63 }
 0x95d   :  { %2113 = vmatpush1.msra.mxu1 %v4614_v24  ;;  %2180 = vmatprep.subr.mxu0 %v4574_v15 }
 0x95e   :  { %2114 = vmatprep.subr.mxu1 %v4621_v26  ;;  %2181 = vmatpush1.msra.mxu0 %v4583_v9 }
 0x95f   :  { %2115 = vmatpush1.msra.mxu1 %v4635_v41  ;;  %2182 = vmatprep.subr.mxu0 %v4592_v30 }
 0x960   :  { %2312 = vmatprep.subr.mxu1 %v4643_v20  ;;  %2183 = vmatpush1.msra.mxu0 %v4601_v40 }
 0x961   :  { %2184 = vmatprep.subr.mxu0 %v4637_v44  ;;  %2222 = vmatprep.mubr.f32.mxu0 %v5286_v0 }
 0x962   :  { %2185 = vmatpush1.msra.mxu0 %v4641_v11 }
 0x963   :  { %2186 = vmatprep.subr.mxu0 %v4649_v18 }
 0x964   :  { %2187 = vmatpush1.msra.mxu0 %v4652_v35 }
 0x965   :  { %2188 = vmatprep.subr.mxu0 %v4656_v33 }
 0x966   :  { %2189 = vmatpush1.msra.mxu0 %v4659_v34 }
 0x967   :  { %2401 = vmatprep.subr.mxu0 %v4420_v21  ;;  %v2006_v21 = vld [vmem:[%s5240_s5] sm:$0x3] }
 0x968   :  { %v2011_v26 = vrot.slane %v2006_v21, %v4064_v27  ;;  %v2015_v11 = vrot.slane %v2006_v21, %v4070_v29 }
 0xa05   :  { %v1701_v12 = vpop.f32.mrf.mxu0 }
 0xa07   :  { %v1703_v52 = vpop.f32.mrf.mxu0 }
 0xa0a   :  { %v1775_v22 = vpop.f32.mrf.mxu1 }
 0xa0b   :  { %v1776_v23 = vadd.f32 %v1775_v22, %v1701_v12 }
 0xa0c   :  { %v1777_v20 = vpop.f32.mrf.mxu1 }
 0xa0d   :  { %v1792_v41 = vadd.f32 %v1785_v19, %v1776_v23  ;;  %v1778_v35 = vadd.f32 %v1777_v20, %v1703_v52 }
 0xa0f   :  { %v1793_v33 = vadd.f32 %v1789_v36, %v1778_v35  ;;  %v2001_v34 = vpop.f32.mrf.mxu1  ;;  %v3646_v35 = vmul.f32 -1.442695, %v1792_v41 }
 0xa11   :  { %3771 = vtanh.f32 %v1793_v33  ;;  %v2003_v12 = vpop.f32.mrf.mxu1 }
 0xa15   :  { %v1924_v18 = vpop.f32.mrf.mxu0 }
 0xa16   :  { %v2002_v24 = vadd.f32 %v2001_v34, %v1924_v18 }
 0xa17   :  { %v1926_v22 = vpop.f32.mrf.mxu0 }
 0xa18   :  { %v2018_v42 = vadd.f32 %v2011_v26, %v2002_v24  ;;  %v2004_v39 = vadd.f32 %v2003_v12, %v1926_v22 }
 0xa1a   :  { %v2019_v38 = vadd.f32 %v2015_v11, %v2004_v39  ;;  %v3650_v19 = vmul.f32 -1.442695, %v2018_v42 }
 0xa1c   :  { %3773 = vtanh.f32 %v2019_v38 }
 0xa1d   :  { %3775 = vpow2.f32 %v3646_v35 }
 0xa1e   :  { %v3772_v52 = vpop.eup %3771  ;;  %3777 = vpow2.f32 %v3650_v19 }
 0xa1f   :  { %1809 = vrot.lane.b32.xlu1 %v3772_v52, %s3928_s25 }
 0xa29   :  { %v3774_v20 = vpop.eup %3773 }
 0xa2a   :  { %2035 = vrot.lane.b32.xlu0 %v3774_v20, %s3928_s25  ;;  %v3776_v23 = vpop.eup %3775 }
 0xa2b   :  { %v1800_v18 = vadd.f32 1.0, %v3776_v23  ;;  %v3778_v34 = vpop.eup %3777 }
 0xa2c   :  { %v2026_v36 = vadd.f32 1.0, %v3778_v34 }
 0xa2d   :  { %3779 = vrcp.f32 %v1800_v18  ;;  %v3647_v18 = vmul.f32 -1.442695, %v1793_v33 }
 0xa2e   :  { %3781 = vrcp.f32 %v2026_v36 }
 0xa3a   :  { %v3780_v24 = vpop.eup %3779 }
 0xa3b   :  { %v3782_v11 = vpop.eup %3781  ;;  %v1807_v41 = vmul.f32 %v3780_v24, %v4628_v45  ;;  %v3651_v45 = vmul.f32 -1.442695, %v2019_v38  ;;  %v2275_v38 = vld [vmem:[%s5235_s0 + $0xd] sm:$0x1] }
 0xa3c   :  { %v2033_v52 = vmul.f32 %v3782_v11, %v4645_v32 }
 0xa91   :  { %v1810_v26 = vpop.permute.xlu1 %1809 }
 0xa92   :  { %v1812_v39 = vmul.f32 %v3780_v24, %v1810_v26 }
 0xa94   :  { %1814 = vrot.lane.b32.xlu1 %v1812_v39, %s3928_s25 }
 0xa9c   :  { %v2036_v21 = vpop.permute.xlu0 %2035 }
 0xa9d   :  { %v2038_v12 = vmul.f32 %v3782_v11, %v2036_v21 }
 0xa9f   :  { %2040 = vrot.lane.b32.xlu0 %v2038_v12, %s3928_s25 }
 0xb06   :  { %v1815_v22 = vpop.permute.xlu1 %1814 }
 0xb07   :  { %v4771_v42 = vadd.f32 %v1815_v22, %v1807_v41  ;;  %v2369_v41 = vrot.slane %v2275_v38, 7  ;;  %v2274_v22 = vld [vmem:[%s5235_s0 + $0x5] sm:$0x1] }
 0xb09   :  { %3783 = vtanh.f32 %v4771_v42 }
 0xb11   :  { %v2041_v20 = vpop.permute.xlu0 %2040 }
 0xb12   :  { %v4775_v35 = vadd.f32 %v2041_v20, %v2033_v52 }
 0xb14   :  { %3785 = vtanh.f32 %v4775_v35 }
 0xb15   :  { %3787 = vpow2.f32 %v3647_v18 }
 0xb16   :  { %v3784_v19 = vpop.eup %3783  ;;  %3789 = vpow2.f32 %v3651_v45 }
 0xb17   :  { %1820 = vrot.lane.b32.xlu1 %v3784_v19, %s3928_s25 }
 0xb21   :  { %v3786_v23 = vpop.eup %3785 }
 0xb22   :  { %2046 = vrot.lane.b32.xlu0 %v3786_v23, %s3928_s25  ;;  %v3788_v34 = vpop.eup %3787 }
 0xb23   :  { %v1801_v36 = vadd.f32 1.0, %v3788_v34  ;;  %v3790_v24 = vpop.eup %3789 }
 0xb24   :  { %v2027_v32 = vadd.f32 1.0, %v3790_v24 }
 0xb25   :  { %3791 = vrcp.f32 %v1801_v36 }
 0xb26   :  { %3793 = vrcp.f32 %v2027_v32 }
 0xb32   :  { %v3792_v26 = vpop.eup %3791 }
 0xb33   :  { %v3794_v33 = vpop.eup %3793 }
 0xb89   :  { %v1821_v39 = vpop.permute.xlu1 %1820 }
 0xb8a   :  { %v4780_v11 = vmul.f32 %v3792_v26, %v1821_v39 }
 0xb8c   :  { %3652 = vmatmul.mubr.msk.f32.vlgmr.msra.gmra.mxu1 %vm76_vm2, %v4780_v11 }
 0xb8d   :  { %2313 = vmatpush1.msra.mxu1 %v4667_v46  ;;  %2360 = vmatprep.mubr.f32.mxu1 %v5286_v0 }
 0xb8e   :  { %2314 = vmatprep.subr.mxu1 %v4669_v28 }
 0xb8f   :  { %2315 = vmatpush1.msra.mxu1 %v4676_v55 }
 0xb90   :  { %2316 = vmatprep.subr.mxu1 %v4682_v37 }
 0xb91   :  { %2317 = vmatpush1.msra.mxu1 %v4686_v16 }
 0xb92   :  { %2318 = vmatprep.subr.mxu1 %v4689_v1 }
 0xb93   :  { %2319 = vmatpush1.msra.mxu1 %v4692_v7 }
 0xb94   :  { %2320 = vmatprep.subr.mxu1 %v4699_v43  ;;  %v2047_v21 = vpop.permute.xlu0 %2046 }
 0xb95   :  { %v2049_v12 = vmul.f32 %v3794_v33, %v2047_v21  ;;  %2321 = vmatpush1.msra.mxu1 %v4435_v53  ;;  %v2370_v53 = vsel %vm154_vm0, %v2369_v41, %v2274_v22 }
 0xb96   :  { %2322 = vmatprep.subr.mxu1 %v4438_v54  ;;  %v5312_v54 = vld [vmem:[#allocation11_spill] sm:$0xff] }
 0xb97   :  { %2323 = vmatpush1.msra.mxu1 %v4444_v3  ;;  %3653 = vmatmul.mubr.msk.f32.vlgmr.msra.gmra.mxu0 %vm76_vm2, %v2049_v12  ;;  %v5313_v3 = vld [vmem:[#allocation15_spill] sm:$0xff] }
 0xb98   :  { %2324 = vmatprep.subr.mxu1 %v4447_v6  ;;  %2402 = vmatpush1.msra.mxu0 %v4453_v10  ;;  %v5314_v6 = vld [vmem:[#allocation14_spill] sm:$0xff]  ;;  %v5315_v10 = vld [vmem:[#allocation12_spill] sm:$0xff] }
 0xb99   :  { %2325 = vmatpush1.msra.mxu1 %v4455_v56  ;;  %2403 = vmatprep.subr.mxu0 %v4461_v13  ;;  %v5316_v56 = vld [vmem:[#allocation17_spill] sm:$0xff]  ;;  %v5317_v13 = vld [vmem:[#allocation8_spill] sm:$0xff] }
 0xb9a   :  { %2326 = vmatprep.subr.mxu1 %v4463_v58  ;;  %2404 = vmatpush1.msra.mxu0 %v4473_v60  ;;  %v5318_v58 = vld [vmem:[#allocation18_spill] sm:$0xff]  ;;  %v5319_v60 = vld [vmem:[#allocation13_spill] sm:$0xff] }
 0xb9b   :  { %2327 = vmatpush1.msra.mxu1 %v4715_v31  ;;  %2437 = vmatprep.mubr.f32.mxu0 %v5286_v0 }
 0xb9c   :  { %3656 = vmatmul.mubr.msk.f32.vlgmr.msra.gmra.mxu1 %vm76_vm2, %v2049_v12  ;;  %3657 = vmatmul.mubr.msk.f32.vlgmr.msra.gmra.mxu0 %vm156_vm1, %v2370_v53 }
 0xb9d   :  { %2539 = vmatprep.subr.mxu0 %v4510_v47  ;;  %2613 = vmatprep.subr.mxu1 %v4534_v2  ;;  %v5320_v47 = vld [vmem:[#allocation19_spill] sm:$0xff] }
 0xb9e   :  { %2540 = vmatpush1.msra.mxu0 %v4515_v48  ;;  %2614 = vmatpush1.msra.mxu1 %v4536_v4  ;;  %v5321_v48 = vld [vmem:[#allocation16_spill] sm:$0xff] }
 0xb9f   :  { %2541 = vmatprep.subr.mxu0 %v4520_v49  ;;  %2615 = vmatprep.subr.mxu1 %v4545_v8  ;;  %v5322_v49 = vld [vmem:[#allocation20_spill] sm:$0xff] }
 0xba0   :  { %2542 = vmatpush1.msra.mxu0 %v4526_v50  ;;  %2616 = vmatpush1.msra.mxu1 %v4554_v59  ;;  %v2229_v50 = vld [vmem:[%s5241_s6] sm:$0x3] }
 0xba1   :  { %2543 = vmatprep.subr.mxu0 %v4532_v51  ;;  %2617 = vmatprep.subr.mxu1 %v4556_v61  ;;  %v2234_v2 = vrot.slane %v2229_v50, %v4064_v27  ;;  %v2238_v8 = vrot.slane %v2229_v50, %v4070_v29 }
 0xba2   :  { %2544 = vmatpush1.msra.mxu0 %v4542_v5  ;;  %2618 = vmatpush1.msra.mxu1 %v4565_v63 }
 0xba3   :  { %2545 = vmatprep.subr.mxu0 %v4551_v57  ;;  %2619 = vmatprep.subr.mxu1 %v4574_v15  ;;  %v2444_v57 = vld [vmem:[%s5240_s5] sm:$0x3] }
 0xba4   :  { %2546 = vmatpush1.msra.mxu0 %v4562_v62  ;;  %2620 = vmatpush1.msra.mxu1 %v4583_v9 }
 0xba5   :  { %2547 = vmatprep.subr.mxu0 %v4571_v14  ;;  %2621 = vmatprep.subr.mxu1 %v4592_v30  ;;  %v2449_v14 = vrot.slane %v2444_v57, %v4064_v27  ;;  %v2453_v30 = vrot.slane %v2444_v57, %v4070_v29 }
 0xba6   :  { %2548 = vmatpush1.msra.mxu0 %v4580_v17  ;;  %2622 = vmatpush1.msra.mxu1 %v4601_v40 }
 0xba7   :  { %2549 = vmatprep.subr.mxu0 %v4589_v25  ;;  %2623 = vmatprep.subr.mxu1 %v4637_v44 }
 0xba8   :  { %2550 = vmatpush1.msra.mxu0 %v5312_v54  ;;  %2587 = vmatprep.mubr.f32.mxu0 %v5286_v0 }
 0xba9   :  { %2551 = vmatprep.subr.mxu0 %v5313_v3  ;;  %2624 = vmatpush1.msra.mxu1 %v5314_v6 }
 0xbaa   :  { %2552 = vmatpush1.msra.mxu0 %v5315_v10  ;;  %2625 = vmatprep.subr.mxu1 %v5316_v56  ;;  %v4874_v56 = vld [vmem:[%s5236_s1 + $0x18] sm:$0xff] }
 0xbab   :  { %2553 = vmatprep.subr.mxu0 %v5317_v13  ;;  %2626 = vmatpush1.msra.mxu1 %v5318_v58 }
 0xbac   :  { %2554 = vmatpush1.msra.mxu0 %v5319_v60  ;;  %2627 = vmatprep.subr.mxu1 %v5320_v47 }
 0xbad   :  { %2762 = vmatprep.subr.mxu0 %v5321_v48  ;;  %2628 = vmatpush1.msra.mxu1 %v5322_v49 }
 0xbae   :  { %2661 = vmatprep.mubr.f32.mxu1 %v5286_v0  ;;  %2851 = vmatprep.subr.mxu1 %v4874_v56 }
 0xc4c   :  { %v2150_v51 = vpop.f32.mrf.mxu1 }
 0xc4e   :  { %v2152_v59 = vpop.f32.mrf.mxu1 }
 0xc57   :  { %v2224_v4 = vpop.f32.mrf.mxu0 }
 0xc58   :  { %v2225_v5 = vadd.f32 %v2224_v4, %v2150_v51  ;;  %v2725_v4 = vld [vmem:[%s5235_s0 + $0xe] sm:$0x1] }
 0xc59   :  { %v2226_v61 = vpop.f32.mrf.mxu0 }
 0xc5a   :  { %v2241_v62 = vadd.f32 %v2234_v2, %v2225_v5  ;;  %v2227_v63 = vadd.f32 %v2226_v61, %v2152_v59  ;;  %v4894_v59 = vld [vmem:[%s5236_s1 + $0x10] sm:$0xff]  ;;  %v2819_v61 = vrot.slane %v2725_v4, 7 }
 0xc5b   :  { %v4994_v4 = vld [vmem:[%s5239_s4 + $0x50] sm:$0xff] }
 0xc5c   :  { %v2242_v15 = vadd.f32 %v2238_v8, %v2227_v63  ;;  %v2362_v17 = vpop.f32.mrf.mxu1  ;;  %v2439_v9 = vpop.f32.mrf.mxu0  ;;  %v3654_v45 = vmul.f32 -1.442695, %v2241_v62  ;;  %v4917_v62 = vld [vmem:[#allocation4 + $0x28] sm:$0xff] }
 0xc5d   :  { %v2440_v25 = vadd.f32 %v2439_v9, %v2362_v17 }
 0xc5e   :  { %v2364_v40 = vpop.f32.mrf.mxu1  ;;  %v2441_v44 = vpop.f32.mrf.mxu0  ;;  %3795 = vtanh.f32 %v2242_v15  ;;  %v3655_v58 = vmul.f32 -1.442695, %v2242_v15 }
 0xc5f   :  { %v2456_v52 = vadd.f32 %v2449_v14, %v2440_v25  ;;  %v2442_v20 = vadd.f32 %v2441_v44, %v2364_v40  ;;  %v4934_v14 = vld [vmem:[#allocation4 + $0x8] sm:$0xff] }
 0xc61   :  { %v2457_v19 = vadd.f32 %v2453_v30, %v2442_v20  ;;  %v3658_v34 = vmul.f32 -1.442695, %v2456_v52 }
 0xc63   :  { %3797 = vtanh.f32 %v2457_v19 }
 0xc64   :  { %3799 = vpow2.f32 %v3654_v45 }
 0xc65   :  { %3801 = vpow2.f32 %v3658_v34 }
 0xc6b   :  { %v3796_v23 = vpop.eup %3795 }
 0xc6c   :  { %2258 = vrot.lane.b32.xlu1 %v3796_v23, %s3928_s25 }
 0xc70   :  { %v3798_v18 = vpop.eup %3797 }
 0xc71   :  { %2473 = vrot.lane.b32.xlu0 %v3798_v18, %s3928_s25  ;;  %v3800_v36 = vpop.eup %3799 }
 0xc72   :  { %v2249_v24 = vadd.f32 1.0, %v3800_v36  ;;  %v3802_v32 = vpop.eup %3801 }
 0xc73   :  { %v2464_v26 = vadd.f32 1.0, %v3802_v32 }
 0xc74   :  { %3803 = vrcp.f32 %v2249_v24 }
 0xc75   :  { %3805 = vrcp.f32 %v2464_v26 }
 0xc81   :  { %v3804_v39 = vpop.eup %3803 }
 0xc82   :  { %v3806_v21 = vpop.eup %3805  ;;  %v2256_v22 = vmul.f32 %v3804_v39, %v4771_v42 }
 0xc83   :  { %v2471_v3 = vmul.f32 %v3806_v21, %v4775_v35  ;;  %v3659_v35 = vmul.f32 -1.442695, %v2457_v19  ;;  %v2894_v19 = vld [vmem:[%s5240_s5] sm:$0x3] }
 0xc84   :  { %v2899_v18 = vrot.slane %v2894_v19, %v4064_v27  ;;  %v2903_v36 = vrot.slane %v2894_v19, %v4070_v29  ;;  %v5072_v19 = vld [vmem:[%s5239_s4] sm:$0xff] }
 0xcde   :  { %v2259_v38 = vpop.permute.xlu1 %2258 }
 0xcdf   :  { %v2261_v33 = vmul.f32 %v3804_v39, %v2259_v38 }
 0xce1   :  { %2263 = vrot.lane.b32.xlu1 %v2261_v33, %s3928_s25 }
 0xce3   :  { %v2474_v12 = vpop.permute.xlu0 %2473 }
 0xce4   :  { %v2476_v41 = vmul.f32 %v3806_v21, %v2474_v12 }
 0xce6   :  { %2478 = vrot.lane.b32.xlu0 %v2476_v41, %s3928_s25 }
 0xd53   :  { %v2264_v53 = vpop.permute.xlu1 %2263 }
 0xd54   :  { %v4864_v54 = vadd.f32 %v2264_v53, %v2256_v22 }
 0xd56   :  { %3807 = vtanh.f32 %v4864_v54 }
 0xd58   :  { %v2479_v6 = vpop.permute.xlu0 %2478 }
 0xd59   :  { %v4868_v10 = vadd.f32 %v2479_v6, %v2471_v3 }
 0xd5b   :  { %3809 = vtanh.f32 %v4868_v10 }
 0xd5c   :  { %3811 = vpow2.f32 %v3655_v58 }
 0xd5d   :  { %3813 = vpow2.f32 %v3659_v35 }
 0xd63   :  { %v3808_v13 = vpop.eup %3807 }
 0xd64   :  { %2269 = vrot.lane.b32.xlu1 %v3808_v13, %s3928_s25 }
 0xd68   :  { %v3810_v42 = vpop.eup %3809 }
 0xd69   :  { %2484 = vrot.lane.b32.xlu0 %v3810_v42, %s3928_s25  ;;  %v3812_v60 = vpop.eup %3811 }
 0xd6a   :  { %v2250_v47 = vadd.f32 1.0, %v3812_v60  ;;  %v3814_v48 = vpop.eup %3813 }
 0xd6b   :  { %v2465_v49 = vadd.f32 1.0, %v3814_v48  ;;  %v4966_v48 = vld [vmem:[%s5239_s4 + $0x78] sm:$0xff] }
 0xd6c   :  { %3815 = vrcp.f32 %v2250_v47 }
 0xd6d   :  { %3817 = vrcp.f32 %v2465_v49  ;;  %v4971_v49 = vld [vmem:[%s5239_s4 + $0x70] sm:$0xff] }
 0xd79   :  { %v3816_v50 = vpop.eup %3815 }
 0xd7a   :  { %v3818_v5 = vpop.eup %3817 }
 0xdd6   :  { %v2270_v51 = vpop.permute.xlu1 %2269 }
 0xdd7   :  { %v2272_v2 = vmul.f32 %v3816_v50, %v2270_v51  ;;  %v4976_v50 = vld [vmem:[%s5239_s4 + $0x68] sm:$0xff]  ;;  %v4982_v51 = vld [vmem:[%s5239_s4 + $0x60] sm:$0xff] }
 0xdd9   :  { %2273 = vst.msk [vmem:[%s5242_s7 + $0x4] sm:$0x3] %vm495_vm3, %v2272_v2  ;;  %3660 = vmatmul.mubr.msk.f32.vlgmr.msra.gmra.mxu0 %vm76_vm2, %v2272_v2  ;;  %v4988_v2 = vld [vmem:[%s5239_s4 + $0x58] sm:$0xff] }
 0xdda   :  { %2763 = vmatpush1.msra.mxu0 %v4667_v46  ;;  %2810 = vmatprep.mubr.f32.mxu0 %v5286_v0  ;;  %v4900_v46 = vld [vmem:[%s5236_s1 + $0x8] sm:$0xff] }
 0xddb   :  { %v2485_v8 = vpop.permute.xlu0 %2484  ;;  %2764 = vmatprep.subr.mxu0 %v4669_v28  ;;  %v2724_v28 = vld [vmem:[%s5235_s0 + $0x6] sm:$0x1] }
 0xddc   :  { %v2487_v57 = vmul.f32 %v3818_v5, %v2485_v8  ;;  %2765 = vmatpush1.msra.mxu0 %v4676_v55  ;;  %v4910_v55 = vld [vmem:[%s5236_s1] sm:$0xff]  ;;  %v2820_v63 = vsel %vm154_vm0, %v2819_v61, %v2724_v28  ;;  %v5000_v5 = vld [vmem:[%s5239_s4 + $0x48] sm:$0xff]  ;;  %v5002_v8 = vld [vmem:[#allocation2 + $0x78] sm:$0xff] }
 0xddd   :  { %2766 = vmatprep.subr.mxu0 %v4682_v37  ;;  %v4913_v37 = vld [vmem:[#allocation4 + $0x30] sm:$0xff]  ;;  %v5010_v61 = vld [vmem:[%s5239_s4 + $0x40] sm:$0xff]  ;;  %v5013_v28 = vld [vmem:[#allocation2 + $0x68] sm:$0xff] }
 0xdde   :  { %3661 = vmatmul.mubr.msk.f32.vlgmr.msra.gmra.mxu1 %vm76_vm2, %v2487_v57  ;;  %2767 = vmatpush1.msra.mxu0 %v4686_v16  ;;  %v4922_v16 = vld [vmem:[#allocation4 + $0x20] sm:$0xff] }
 0xddf   :  { %2768 = vmatprep.subr.mxu0 %v4689_v1  ;;  %2852 = vmatpush1.msra.mxu1 %v4894_v59  ;;  %v4926_v1 = vld [vmem:[#allocation4 + $0x18] sm:$0xff] }
 0xde0   :  { %2769 = vmatpush1.msra.mxu0 %v4692_v7  ;;  %2853 = vmatprep.subr.mxu1 %v4900_v46  ;;  %v4930_v7 = vld [vmem:[#allocation4 + $0x10] sm:$0xff] }
 0xde1   :  { %2770 = vmatprep.subr.mxu0 %v4699_v43  ;;  %2854 = vmatpush1.msra.mxu1 %v4910_v55  ;;  %v2668_v43 = vld [vmem:[%s5241_s6] sm:$0x3] }
 0xde2   :  { %2771 = vmatpush1.msra.mxu0 %v4913_v37  ;;  %2887 = vmatprep.mubr.f32.mxu1 %v5286_v0  ;;  %v2673_v17 = vrot.slane %v2668_v43, %v4064_v27  ;;  %v2677_v30 = vrot.slane %v2668_v43, %v4070_v29  ;;  %v5022_v43 = vld [vmem:[#allocation2 + $0x60] sm:$0xff] }
 0xde3   :  { %2772 = vmatprep.subr.mxu0 %v4917_v62  ;;  %3665 = vmatmul.mubr.msk.f32.vlgmr.msra.gmra.mxu1 %vm156_vm1, %v2820_v63  ;;  %v5019_v63 = vld [vmem:[%s5239_s4 + $0x38] sm:$0xff] }
 0xde4   :  { %2773 = vmatpush1.msra.mxu0 %v4922_v16  ;;  %3036 = vmatprep.mubr.f32.mxu1 %v5286_v0 }
 0xde5   :  { %2774 = vmatprep.subr.mxu0 %v4926_v1  ;;  %2988 = vmatprep.subr.mxu1 %v4966_v48 }
 0xde6   :  { %2775 = vmatpush1.msra.mxu0 %v4930_v7  ;;  %2989 = vmatpush1.msra.mxu1 %v4971_v49 }
 0xde7   :  { %2776 = vmatprep.subr.mxu0 %v4934_v14  ;;  %2990 = vmatprep.subr.mxu1 %v4976_v50 }
 0xde8   :  { %2777 = vmatpush1.msra.mxu0 %v4715_v31  ;;  %2991 = vmatpush1.msra.mxu1 %v4982_v51 }
 0xde9   :  { %3664 = vmatmul.mubr.msk.f32.vlgmr.msra.gmra.mxu0 %vm76_vm2, %v2487_v57  ;;  %v5004_v57 = vld [vmem:[#allocation2 + $0x70] sm:$0xff]  ;;  %2992 = vmatprep.subr.mxu1 %v4988_v2 }
 0xdea   :  { %3110 = vmatprep.mubr.f32.mxu0 %v5286_v0  ;;  %3062 = vmatprep.subr.mxu0 %v5002_v8 }
 0xdeb   :  { %2993 = vmatpush1.msra.mxu1 %v4994_v4  ;;  %3063 = vmatpush1.msra.mxu0 %v5004_v57 }
 0xdec   :  { %2994 = vmatprep.subr.mxu1 %v5000_v5  ;;  %3064 = vmatprep.subr.mxu0 %v5013_v28 }
 0xded   :  { %2995 = vmatpush1.msra.mxu1 %v5010_v61  ;;  %3065 = vmatpush1.msra.mxu0 %v5022_v43 }
 0xdee   :  { %2996 = vmatprep.subr.mxu1 %v5019_v63 }
 0xe99   :  { %v2589_v15 = vpop.f32.mrf.mxu0 }
 0xe9b   :  { %v2591_v40 = vpop.f32.mrf.mxu0 }
 0xe9e   :  { %v2663_v9 = vpop.f32.mrf.mxu1 }
 0xe9f   :  { %v2664_v25 = vadd.f32 %v2663_v9, %v2589_v15  ;;  %v5028_v15 = vld [vmem:[%s5239_s4 + $0x30] sm:$0xff]  ;;  %v5042_v9 = vld [vmem:[%s5239_s4 + $0x20] sm:$0xff] }
 0xea0   :  { %v2665_v44 = vpop.f32.mrf.mxu1  ;;  %2997 = vmatpush1.msra.mxu1 %v5028_v15 }
 0xea1   :  { %v2680_v52 = vadd.f32 %v2673_v17, %v2664_v25  ;;  %v2666_v20 = vadd.f32 %v2665_v44, %v2591_v40  ;;  %v5035_v17 = vld [vmem:[%s5239_s4 + $0x28] sm:$0xff]  ;;  %v5048_v25 = vld [vmem:[%s5239_s4 + $0x18] sm:$0xff] }
 0xea2   :  { %2998 = vmatprep.subr.mxu1 %v5035_v17  ;;  %v5060_v40 = vld [vmem:[%s5239_s4 + $0x8] sm:$0xff] }
 0xea3   :  { %v4948_v31 = vadd.f32 %v2677_v30, %v2666_v20  ;;  %v2889_v23 = vpop.f32.mrf.mxu1  ;;  %v3662_v12 = vmul.f32 -1.442695, %v2680_v52  ;;  %v5054_v30 = vld [vmem:[%s5239_s4 + $0x10] sm:$0xff]  ;;  %2999 = vmatpush1.msra.mxu1 %v5042_v9 }
 0xea4   :  { %3000 = vmatprep.subr.mxu1 %v5048_v25 }
 0xea5   :  { %3819 = vtanh.f32 %v4948_v31  ;;  %v2891_v24 = vpop.f32.mrf.mxu1  ;;  %3001 = vmatpush1.msra.mxu1 %v5054_v30 }
 0xea6   :  { %3002 = vmatprep.subr.mxu1 %v5060_v40 }
 0xea7   :  { %3003 = vmatpush1.msra.mxu1 %v5072_v19 }
 0xea9   :  { %v2812_v45 = vpop.f32.mrf.mxu0 }
 0xeaa   :  { %v2890_v34 = vadd.f32 %v2889_v23, %v2812_v45  ;;  %v5075_v23 = vld [vmem:[#allocation2 + $0x58] sm:$0xff]  ;;  %v5078_v45 = vld [vmem:[#allocation2 + $0x50] sm:$0xff] }
 0xeab   :  { %v2814_v32 = vpop.f32.mrf.mxu0  ;;  %3066 = vmatprep.subr.mxu0 %v5075_v23 }
 0xeac   :  { %v2906_v26 = vadd.f32 %v2899_v18, %v2890_v34  ;;  %v2892_v39 = vadd.f32 %v2891_v24, %v2814_v32  ;;  %v3183_v18 = vld [vmem:[#allocation4 + $0x78] sm:$0xff]  ;;  %3067 = vmatpush1.msra.mxu0 %v5078_v45  ;;  %v5084_v34 = vld [vmem:[#allocation2 + $0x40] sm:$0xff]  ;;  %v5090_v24 = vld [vmem:[#allocation2 + $0x30] sm:$0xff] }
 0xead   :  { %3200 = vmatprep.subr.mxu1 %v3183_v18  ;;  %v3181_v18 = vld [vmem:[#allocation4 + $0x68] sm:$0xff] }
 0xeae   :  { %v4956_v38 = vadd.f32 %v2903_v36, %v2892_v39  ;;  %v3666_v41 = vmul.f32 -1.442695, %v2906_v26  ;;  %v5087_v36 = vld [vmem:[#allocation2 + $0x38] sm:$0xff]  ;;  %v5094_v26 = vld [vmem:[#allocation2 + $0x28] sm:$0xff] }
 0xeb0   :  { %3821 = vtanh.f32 %v4956_v38 }
 0xeb1   :  { %3823 = vpow2.f32 %v3662_v12  ;;  %v5102_v12 = vld [vmem:[#allocation2 + $0x18] sm:$0xff] }
 0xeb2   :  { %v3820_v33 = vpop.eup %3819  ;;  %3825 = vpow2.f32 %v3666_v41  ;;  %v5105_v41 = vld [vmem:[#allocation2 + $0x10] sm:$0xff] }
 0xeb3   :  { %2697 = vrot.lane.b32.xlu1 %v3820_v33, %s3928_s25  ;;  %v5097_v33 = vld [vmem:[#allocation2 + $0x20] sm:$0xff] }
 0xebd   :  { %v3822_v21 = vpop.eup %3821 }
 0xebe   :  { %2923 = vrot.lane.b32.xlu0 %v3822_v21, %s3928_s25  ;;  %v3824_v22 = vpop.eup %3823 }
 0xebf   :  { %v2688_v53 = vadd.f32 1.0, %v3824_v22  ;;  %v3826_v3 = vpop.eup %3825  ;;  %v5112_v22 = vld [vmem:[#allocation2] sm:$0xff] }
 0xec0   :  { %v2914_v6 = vadd.f32 1.0, %v3826_v3 }
 0xec1   :  { %3827 = vrcp.f32 %v2688_v53 }
 0xec2   :  { %3829 = vrcp.f32 %v2914_v6  ;;  %v3663_v6 = vmul.f32 -1.442695, %v4948_v31  ;;  %v3180_v31 = vld [vmem:[#allocation4 + $0x60] sm:$0xff] }
 0xece   :  { %v3828_v13 = vpop.eup %3827 }
 0xecf   :  { %v3830_v35 = vpop.eup %3829  ;;  %v2695_v44 = vmul.f32 %v3828_v13, %v4864_v54  ;;  %v5081_v54 = vld [vmem:[#allocation2 + $0x48] sm:$0xff] }
 0xed0   :  { %3068 = vmatprep.subr.mxu0 %v5081_v54  ;;  %v2921_v32 = vmul.f32 %v3830_v35, %v4868_v10  ;;  %v5109_v10 = vld [vmem:[#allocation2 + $0x8] sm:$0xff] }
 0xed1   :  { %3069 = vmatpush1.msra.mxu0 %v5084_v34 }
 0xed2   :  { %3070 = vmatprep.subr.mxu0 %v5087_v36 }
 0xed3   :  { %3071 = vmatpush1.msra.mxu0 %v5090_v24 }
 0xed4   :  { %3072 = vmatprep.subr.mxu0 %v5094_v26 }
 0xed5   :  { %3073 = vmatpush1.msra.mxu0 %v5097_v33 }
 0xed6   :  { %3074 = vmatprep.subr.mxu0 %v5102_v12 }
 0xed7   :  { %3075 = vmatpush1.msra.mxu0 %v5105_v41 }
 0xed8   :  { %3076 = vmatprep.subr.mxu0 %v5109_v10 }
 0xed9   :  { %3077 = vmatpush1.msra.mxu0 %v5112_v22 }
 0xeda   :  { %3289 = vmatprep.subr.mxu0 %v4874_v56  ;;  %v3182_v56 = vld [vmem:[#allocation4 + $0x70] sm:$0xff] }
 0xf25   :  { %v2698_v42 = vpop.permute.xlu1 %2697 }
 0xf26   :  { %v2700_v58 = vmul.f32 %v3828_v13, %v2698_v42  ;;  %v3667_v13 = vmul.f32 -1.442695, %v4956_v38  ;;  %v3178_v38 = vld [vmem:[#allocation4 + $0x50] sm:$0xff] }
 0xf28   :  { %2702 = vrot.lane.b32.xlu1 %v2700_v58, %s3928_s25 }
 0xf30   :  { %v2924_v60 = vpop.permute.xlu0 %2923 }
 0xf31   :  { %v2926_v47 = vmul.f32 %v3830_v35, %v2924_v60 }
 0xf33   :  { %2928 = vrot.lane.b32.xlu0 %v2926_v47, %s3928_s25 }
 0xf9a   :  { %v2703_v52 = vpop.permute.xlu1 %2702 }
 0xf9b   :  { %v5066_v20 = vadd.f32 %v2703_v52, %v2695_v44 }
 0xf9d   :  { %3831 = vtanh.f32 %v5066_v20 }
 0xfa5   :  { %v2929_v39 = vpop.permute.xlu0 %2928 }
 0xfa6   :  { %v5099_v21 = vadd.f32 %v2929_v39, %v2921_v32  ;;  %v3179_v32 = vld [vmem:[#allocation4 + $0x58] sm:$0xff]  ;;  %v3177_v39 = vld [vmem:[#allocation4 + $0x48] sm:$0xff] }
 0xfa8   :  { %3833 = vtanh.f32 %v5099_v21 }
 0xfa9   :  { %3835 = vpow2.f32 %v3663_v6  ;;  %v3163_v6 = vld [vmem:[%s5235_s0 + $0xf] sm:$0x1] }
 0xfaa   :  { %v3832_v53 = vpop.eup %3831  ;;  %3837 = vpow2.f32 %v3667_v13 }
 0xfab   :  { %2708 = vrot.lane.b32.xlu1 %v3832_v53, %s3928_s25  ;;  %v3176_v53 = vld [vmem:[#allocation4 + $0x40] sm:$0xff] }
 0xfb5   :  { %v3834_v3 = vpop.eup %3833 }
 0xfb6   :  { %2934 = vrot.lane.b32.xlu0 %v3834_v3, %s3928_s25  ;;  %v3836_v42 = vpop.eup %3835  ;;  %v3175_v3 = vld [vmem:[#allocation4 + $0x38] sm:$0xff] }
 0xfb7   :  { %v2689_v58 = vadd.f32 1.0, %v3836_v42  ;;  %v3838_v35 = vpop.eup %3837 }
 0xfb8   :  { %v2915_v60 = vadd.f32 1.0, %v3838_v35  ;;  %v3257_v35 = vrot.slane %v3163_v6, 7 }
 0xfb9   :  { %3839 = vrcp.f32 %v2689_v58 }
 0xfba   :  { %3841 = vrcp.f32 %v2915_v60  ;;  %v3162_v60 = vld [vmem:[%s5235_s0 + $0x7] sm:$0x1] }
 0xfc6   :  { %v3840_v47 = vpop.eup %3839 }
 0xfc7   :  { %v3842_v13 = vpop.eup %3841 }
0x101d   :  { %v2709_v44 = vpop.permute.xlu1 %2708 }
0x101e   :  { %v5120_v52 = vmul.f32 %v3840_v47, %v2709_v44  ;;  %v3168_v47 = vld [vmem:[#allocation4] sm:$0xff] }
0x1020   :  { %3668 = vmatmul.mubr.msk.f32.vlgmr.msra.gmra.mxu1 %vm76_vm2, %v5120_v52 }
0x1021   :  { %3201 = vmatpush1.msra.mxu1 %v3182_v56  ;;  %3248 = vmatprep.mubr.f32.mxu1 %v5286_v0 }
0x1022   :  { %3202 = vmatprep.subr.mxu1 %v3181_v18 }
0x1023   :  { %3203 = vmatpush1.msra.mxu1 %v3180_v31 }
0x1024   :  { %3204 = vmatprep.subr.mxu1 %v3179_v32 }
0x1025   :  { %3205 = vmatpush1.msra.mxu1 %v3178_v38 }
0x1026   :  { %3206 = vmatprep.subr.mxu1 %v3177_v39 }
0x1027   :  { %3207 = vmatpush1.msra.mxu1 %v3176_v53 }
0x1028   :  { %3208 = vmatprep.subr.mxu1 %v3175_v3  ;;  %v2935_v42 = vpop.permute.xlu0 %2934 }
0x1029   :  { %v2937_v58 = vmul.f32 %v3842_v13, %v2935_v42  ;;  %3209 = vmatpush1.msra.mxu1 %v4913_v37  ;;  %v3258_v37 = vsel %vm154_vm0, %v3257_v35, %v3162_v60  ;;  %v3556_v35 = vld [vmem:[%s5241_s6] sm:$0x3] }
0x102a   :  { %3210 = vmatprep.subr.mxu1 %v4917_v62 }
0x102b   :  { %3211 = vmatpush1.msra.mxu1 %v4922_v16  ;;  %3669 = vmatmul.mubr.msk.f32.vlgmr.msra.gmra.mxu0 %vm76_vm2, %v2937_v58 }
0x102c   :  { %3212 = vmatprep.subr.mxu1 %v4926_v1  ;;  %3290 = vmatpush1.msra.mxu0 %v4894_v59  ;;  %v3117_v59 = vld [vmem:[%s5241_s6] sm:$0x3] }
0x102d   :  { %3213 = vmatpush1.msra.mxu1 %v4930_v7  ;;  %3291 = vmatprep.subr.mxu0 %v4900_v46  ;;  %v3126_v1 = vrot.slane %v3117_v59, %v4070_v29  ;;  %v3332_v7 = vld [vmem:[%s5240_s5] sm:$0x3] }
0x102e   :  { %3214 = vmatprep.subr.mxu1 %v4934_v14  ;;  %3292 = vmatpush1.msra.mxu0 %v4910_v55  ;;  %v3122_v55 = vrot.slane %v3117_v59, %v4064_v27 }
0x102f   :  { %3215 = vmatpush1.msra.mxu1 %v3168_v47  ;;  %3325 = vmatprep.mubr.f32.mxu0 %v5286_v0  ;;  %v3561_v47 = vrot.slane %v3556_v35, %v4064_v27 }
0x1030   :  { %3672 = vmatmul.mubr.msk.f32.vlgmr.msra.gmra.mxu1 %vm76_vm2, %v2937_v58  ;;  %3673 = vmatmul.mubr.msk.f32.vlgmr.msra.gmra.mxu0 %vm156_vm1, %v3258_v37 }
0x1031   :  { %3427 = vmatprep.subr.mxu0 %v4966_v48  ;;  %3501 = vmatprep.subr.mxu1 %v5002_v8  ;;  %v3341_v8 = vrot.slane %v3332_v7, %v4070_v29 }
0x1032   :  { %3428 = vmatpush1.msra.mxu0 %v4971_v49  ;;  %3502 = vmatpush1.msra.mxu1 %v5004_v57 }
0x1033   :  { %3429 = vmatprep.subr.mxu0 %v4976_v50  ;;  %3503 = vmatprep.subr.mxu1 %v5013_v28 }
0x1034   :  { %3430 = vmatpush1.msra.mxu0 %v4982_v51  ;;  %3504 = vmatpush1.msra.mxu1 %v5022_v43 }
0x1035   :  { %3431 = vmatprep.subr.mxu0 %v4988_v2  ;;  %3505 = vmatprep.subr.mxu1 %v5075_v23 }
0x1036   :  { %3432 = vmatpush1.msra.mxu0 %v4994_v4  ;;  %3506 = vmatpush1.msra.mxu1 %v5078_v45 }
0x1037   :  { %3433 = vmatprep.subr.mxu0 %v5000_v5  ;;  %3507 = vmatprep.subr.mxu1 %v5081_v54 }
0x1038   :  { %3434 = vmatpush1.msra.mxu0 %v5010_v61  ;;  %3508 = vmatpush1.msra.mxu1 %v5084_v34 }
0x1039   :  { %3435 = vmatprep.subr.mxu0 %v5019_v63  ;;  %3509 = vmatprep.subr.mxu1 %v5087_v36 }
0x103a   :  { %3436 = vmatpush1.msra.mxu0 %v5028_v15  ;;  %3510 = vmatpush1.msra.mxu1 %v5090_v24 }
0x103b   :  { %3437 = vmatprep.subr.mxu0 %v5035_v17  ;;  %3511 = vmatprep.subr.mxu1 %v5094_v26 }
0x103c   :  { %3438 = vmatpush1.msra.mxu0 %v5042_v9  ;;  %3475 = vmatprep.mubr.f32.mxu0 %v5286_v0 }
0x103d   :  { %3439 = vmatprep.subr.mxu0 %v5048_v25  ;;  %3512 = vmatpush1.msra.mxu1 %v5097_v33 }
0x103e   :  { %3440 = vmatpush1.msra.mxu0 %v5054_v30  ;;  %3513 = vmatprep.subr.mxu1 %v5102_v12 }
0x103f   :  { %3441 = vmatprep.subr.mxu0 %v5060_v40  ;;  %3514 = vmatpush1.msra.mxu1 %v5105_v41 }
0x1040   :  { %3442 = vmatpush1.msra.mxu0 %v5072_v19  ;;  %3515 = vmatprep.subr.mxu1 %v5109_v10 }
0x1041   :  { %3516 = vmatpush1.msra.mxu1 %v5112_v22  ;;  %3549 = vmatprep.mubr.f32.mxu1 %v5286_v0  ;;  %v3337_v0 = vrot.slane %v3332_v7, %v4064_v27 }
0x10e0   :  { %v3038_v46 = vpop.f32.mrf.mxu1 }
0x10e2   :  { %v3040_v14 = vpop.f32.mrf.mxu1 }
0x10eb   :  { %v3112_v62 = vpop.f32.mrf.mxu0 }
0x10ec   :  { %v3113_v16 = vadd.f32 %v3112_v62, %v3038_v46  ;;  %v3565_v46 = vrot.slane %v3556_v35, %v4070_v29  ;;  %v5323_v29 = vld [vmem:[#allocation10_spill] sm:$0xff] }
0x10ed   :  { %v3114_v48 = vpop.f32.mrf.mxu0 }
0x10ee   :  { %v3129_v49 = vadd.f32 %v3122_v55, %v3113_v16  ;;  %v3115_v50 = vadd.f32 %v3114_v48, %v3040_v14 }
0x10f0   :  { %v3130_v51 = vadd.f32 %v3126_v1, %v3115_v50  ;;  %v3250_v2 = vpop.f32.mrf.mxu1  ;;  %v3327_v4 = vpop.f32.mrf.mxu0  ;;  %v3670_v9 = vmul.f32 -1.442695, %v3129_v49 }
0x10f1   :  { %v3328_v5 = vadd.f32 %v3327_v4, %v3250_v2 }
0x10f2   :  { %v3252_v57 = vpop.f32.mrf.mxu1  ;;  %v3329_v61 = vpop.f32.mrf.mxu0  ;;  %3843 = vtanh.f32 %v3130_v51  ;;  %v3671_v31 = vmul.f32 -1.442695, %v3130_v51 }
0x10f3   :  { %v3344_v28 = vadd.f32 %v3337_v0, %v3328_v5  ;;  %v3330_v63 = vadd.f32 %v3329_v61, %v3252_v57  ;;  %v3929_v0 = vmov 1983009808   ;;  %v5324_v57 = vld [vmem:[#allocation9_spill] sm:$0xff] }
0x10f4   :  { %v937_v27 = vunpack.c.l.s4 %v3929_v0 }
0x10f5   :  { %v3345_v43 = vadd.f32 %v3341_v8, %v3330_v63  ;;  %v3674_v25 = vmul.f32 -1.442695, %v3344_v28 }
0x10f6   :  { %v938_v51 = vunpack.c.0.s8 %v937_v27 }
0x10f7   :  { %3845 = vtanh.f32 %v3345_v43  ;;  %v3675_v32 = vmul.f32 -1.442695, %v3345_v43 }
0x10f8   :  { %3847 = vpow2.f32 %v3670_v9  ;;  %v941_v5 = vsub.s32 %v938_v51, %v5323_v29 }
0x10f9   :  { %3849 = vpow2.f32 %v3674_v25 }
0x10fa   :  { %v942_v61 = vrot.slane %v5324_v57, %v941_v5  ;;  %v2719_v28 = vrot.slane %v5120_v52, %v941_v5  ;;  %v1831_v25 = vrot.slane %v4780_v11, %v941_v5 }
0x10ff   :  { %v3844_v15 = vpop.eup %3843 }
0x1100   :  { %3146 = vrot.lane.b32.xlu1 %v3844_v15, %s3928_s25 }
0x1104   :  { %v3846_v17 = vpop.eup %3845 }
0x1105   :  { %3361 = vrot.lane.b32.xlu0 %v3846_v17, %s3928_s25  ;;  %v3848_v30 = vpop.eup %3847 }
0x1106   :  { %v3137_v40 = vadd.f32 1.0, %v3848_v30  ;;  %v3850_v19 = vpop.eup %3849 }
0x1107   :  { %v3352_v23 = vadd.f32 1.0, %v3850_v19 }
0x1108   :  { %3851 = vrcp.f32 %v3137_v40 }
0x1109   :  { %3853 = vrcp.f32 %v3352_v23 }
0x1115   :  { %v3852_v45 = vpop.eup %3851 }
0x1116   :  { %v3854_v36 = vpop.eup %3853  ;;  %v3144_v33 = vmul.f32 %v3852_v45, %v5066_v20 }
0x1117   :  { %v3359_v10 = vmul.f32 %v3854_v36, %v5099_v21 }
0x1172   :  { %v3147_v54 = vpop.permute.xlu1 %3146 }
0x1173   :  { %v3149_v34 = vmul.f32 %v3852_v45, %v3147_v54 }
0x1175   :  { %3151 = vrot.lane.b32.xlu1 %v3149_v34, %s3928_s25 }
0x1177   :  { %v3362_v24 = vpop.permute.xlu0 %3361 }
0x1178   :  { %v3364_v26 = vmul.f32 %v3854_v36, %v3362_v24 }
0x117a   :  { %3366 = vrot.lane.b32.xlu0 %v3364_v26, %s3928_s25 }
0x11e7   :  { %v3152_v12 = vpop.permute.xlu1 %3151 }
0x11e8   :  { %v3154_v41 = vadd.f32 %v3152_v12, %v3144_v33 }
0x11ea   :  { %3855 = vtanh.f32 %v3154_v41 }
0x11ec   :  { %v3367_v22 = vpop.permute.xlu0 %3366 }
0x11ed   :  { %v3369_v44 = vadd.f32 %v3367_v22, %v3359_v10 }
0x11ef   :  { %3857 = vtanh.f32 %v3369_v44 }
0x11f0   :  { %3859 = vpow2.f32 %v3671_v31 }
0x11f1   :  { %3861 = vpow2.f32 %v3675_v32 }
0x11f7   :  { %v3856_v56 = vpop.eup %3855 }
0x11f8   :  { %3157 = vrot.lane.b32.xlu1 %v3856_v56, %s3928_s25 }
0x11fc   :  { %v3858_v18 = vpop.eup %3857 }
0x11fd   :  { %3372 = vrot.lane.b32.xlu0 %v3858_v18, %s3928_s25  ;;  %v3860_v38 = vpop.eup %3859 }
0x11fe   :  { %v3138_v20 = vadd.f32 1.0, %v3860_v38  ;;  %v3862_v39 = vpop.eup %3861 }
0x11ff   :  { %v3353_v53 = vadd.f32 1.0, %v3862_v39 }
0x1200   :  { %3863 = vrcp.f32 %v3138_v20 }
0x1201   :  { %3865 = vrcp.f32 %v3353_v53 }
0x120d   :  { %v3864_v21 = vpop.eup %3863 }
0x120e   :  { %v3866_v13 = vpop.eup %3865 }
0x126a   :  { %v3158_v3 = vpop.permute.xlu1 %3157 }
0x126b   :  { %v3160_v6 = vmul.f32 %v3864_v21, %v3158_v3 }
0x126d   :  { %3161 = vst.msk [vmem:[%s5242_s7 + $0x6] sm:$0x3] %vm495_vm3, %v3160_v6  ;;  %3676 = vmatmul.mubr.msk.f32.vlgmr.msra.gmra.mxu0 %vm76_vm2, %v3160_v6 }
0x126f   :  { %v3373_v42 = vpop.permute.xlu0 %3372 }
0x1270   :  { %v3375_v58 = vmul.f32 %v3866_v13, %v3373_v42 }
0x1272   :  { %3677 = vmatmul.mubr.msk.f32.vlgmr.msra.gmra.mxu1 %vm76_vm2, %v3375_v58 }
0x132d   :  { %v3477_v60 = vpop.f32.mrf.mxu0 }
0x132f   :  { %v3479_v55 = vpop.f32.mrf.mxu0 }
0x1332   :  { %v3551_v37 = vpop.f32.mrf.mxu1 }
0x1333   :  { %v3552_v59 = vadd.f32 %v3551_v37, %v3477_v60 }
0x1334   :  { %v3553_v62 = vpop.f32.mrf.mxu1 }
0x1335   :  { %v3568_v16 = vadd.f32 %v3561_v47, %v3552_v59  ;;  %v3554_v1 = vadd.f32 %v3553_v62, %v3479_v55 }
0x1337   :  { %v3569_v7 = vadd.f32 %v3565_v46, %v3554_v1  ;;  %v3678_v48 = vmul.f32 -1.442695, %v3568_v16 }
0x1339   :  { %3867 = vtanh.f32 %v3569_v7  ;;  %v3679_v30 = vmul.f32 -1.442695, %v3569_v7 }
0x133a   :  { %3869 = vpow2.f32 %v3678_v48 }
0x1346   :  { %v3868_v14 = vpop.eup %3867 }
0x1347   :  { %3585 = vrot.lane.b32.xlu1 %v3868_v14, %s3928_s25  ;;  %v3870_v49 = vpop.eup %3869 }
0x1348   :  { %v3576_v50 = vadd.f32 1.0, %v3870_v49 }
0x134a   :  { %3871 = vrcp.f32 %v3576_v50 }
0x1357   :  { %v3872_v2 = vpop.eup %3871 }
0x1358   :  { %v3583_v63 = vmul.f32 %v3872_v2, %v3154_v41 }
0x13b9   :  { %v3586_v4 = vpop.permute.xlu1 %3585 }
0x13ba   :  { %v3588_v8 = vmul.f32 %v3872_v2, %v3586_v4 }
0x13bc   :  { %3590 = vrot.lane.b32.xlu0 %v3588_v8, %s3928_s25 }
0x13c0   :  { %943 = vrot.lane.b32.xlu0 %v942_v61, %s3928_s25 }
0x13c4   :  { %2720 = vrot.lane.b32.xlu0 %v2719_v28, %s3928_s25 }
0x142e   :  { %v3591_v43 = vpop.permute.xlu0 %3590 }
0x142f   :  { %v3593_v15 = vadd.f32 %v3591_v43, %v3583_v63 }
0x1431   :  { %3873 = vtanh.f32 %v3593_v15 }
0x1432   :  { %v944_v17 = vpop.permute.xlu0 %943  ;;  %3875 = vpow2.f32 %v3679_v30 }
0x1433   :  { %947 = vst.msk [vmem:[%s5242_s7] sm:$0x3] %vm946_vm4, %v944_v17 }
0x1436   :  { %v2721_v9 = vpop.permute.xlu0 %2720 }
0x1437   :  { %2723 = vst.msk [vmem:[%s5242_s7 + $0x4] sm:$0x3] %vm946_vm4, %v2721_v9 }
0x143e   :  { %v3874_v52 = vpop.eup %3873 }
0x143f   :  { %3596 = vrot.lane.b32.xlu1 %v3874_v52, %s3928_s25  ;;  %v3876_v40 = vpop.eup %3875 }
0x1440   :  { %v3577_v19 = vadd.f32 1.0, %v3876_v40 }
0x1442   :  { %3877 = vrcp.f32 %v3577_v19 }
0x1443   :  { %1832 = vrot.lane.b32.xlu1 %v1831_v25, %s3928_s25 }
0x144f   :  { %v3878_v23 = vpop.eup %3877 }
0x14b1   :  { %v3597_v45 = vpop.permute.xlu1 %3596 }
0x14b2   :  { %v3599_v54 = vmul.f32 %v3878_v23, %v3597_v45 }
0x14b4   :  { %v3607_v34 = vrot.slane %v3599_v54, %v941_v5 }
0x14b5   :  { %v1833_v36 = vpop.permute.xlu1 %1832 }
0x14b6   :  { %1835 = vst.msk [vmem:[%s5242_s7 + $0x2] sm:$0x3] %vm946_vm4, %v1833_v36  ;;  %3608 = vrot.lane.b32.xlu1 %v3607_v34, %s3928_s25 }
0x1528   :  { %v3609_v11 = vpop.permute.xlu1 %3608 }
0x1529   :  { %3611 = vst.msk [vmem:[%s5242_s7 + $0x6] sm:$0x3] %vm946_vm4, %v3609_v11 }
0x152a   :  { %3616 = vsyncpa [#allocation3], 1 }
0x152b   :  { %3617 = vsyncpa [#allocation5], 1 }

</bundles_post_ra>
